<compile_context>
chip_gen: v7x
topology: tpu7x:2x2x1
jax: 0.10.0
libtpu: 0.0.40
codegen_flags: <defaults>
</compile_context>

<pallas_src>
import jax
import jax.numpy as jnp
from jax.experimental import pallas as pl
from jax.experimental.pallas import tpu as pltpu


def _make_bottleneck_kernel(D, H, W, width):
    HW = H * W
    M = D * H * W

    def kernel(x_ref, w1_ref, w2_ref, w3_ref, b1_ref, b2_ref, b3_ref,
               mask_ref, out_ref, slab_ref):
        # conv1 (1x1x1) + folded BN1 + ReLU : (width, Cin) @ (Cin, M) -> (width, M)
        h1 = jnp.maximum(
            jnp.dot(w1_ref[...], x_ref[0],
                    preferred_element_type=jnp.float32) + b1_ref[...],
            0.0)

        # conv2 (3x3x3, stride=1, padding=1): build the im2col slab with
        # static lane rolls (XLU slot, idle otherwise) + precomputed boundary
        # masks, then a single K = 27*width MXU contraction.
        k = 0
        for kd in range(3):
            for kh in range(3):
                for kw in range(3):
                    off = (kd - 1) * HW + (kh - 1) * W + (kw - 1)
                    if kd == 1 and kh == 1 and kw == 1:
                        tap = h1                       # center tap: no shift, no mask
                    else:
                        tap = pltpu.roll(h1, shift=(-off) % M, axis=1)
                        tap = tap * mask_ref[k:k + 1, :]
                    slab_ref[k * width:(k + 1) * width, :] = tap
                    k += 1
        h2 = jnp.maximum(
            jnp.dot(w2_ref[...], slab_ref[...],
                    preferred_element_type=jnp.float32) + b2_ref[...],
            0.0)                                       # (width, M)

        # conv3 (1x1x1) + folded BN3, identity residual add, ReLU.
        h3 = jnp.dot(w3_ref[...], h2,
                     preferred_element_type=jnp.float32) + b3_ref[...]
        # Re-read x_ref here (instead of keeping it live across the convs).
        out_ref[0] = jnp.maximum(h3 + x_ref[0], 0.0).astype(out_ref.dtype)

    return kernel


def bottleneck_pallas(x_ncdhw, params, eps=1e-5):
    """x_ncdhw: (N, Cin, D, H, W) float32.  Returns (N, Cout, D, H, W)."""
    N, Cin, D, H, W = x_ncdhw.shape
    w1, w2, w3 = params["w1"], params["w2"], params["w3"]
    width = w1.shape[0]
    Cout = w3.shape[0]
    M = D * H * W
    assert Cout == Cin, "identity residual requires inplanes == planes * expansion"
    assert M % 128 == 0 and Cin % 8 == 0, "lane/sublane alignment of (C, M) layout"

    def fold(gamma, beta, mean, var):
        scale = gamma / jnp.sqrt(var + eps)
        bias = beta - mean * scale
        return scale, bias

    s1, bias1 = fold(*params["bn1"])
    s2, bias2 = fold(*params["bn2"])
    s3, bias3 = fold(*params["bn3"])

    # Fold BN scales into the (bias-free) conv weights; (Cout, K) layouts.
    w1f = w1[:, :, 0, 0, 0] * s1[:, None]                               # (width, Cin)
    w2f = (jnp.transpose(w2, (0, 2, 3, 4, 1)).reshape(width, 27 * width)
           * s2[:, None])                                               # (width, 27*width)
    w3f = w3[:, :, 0, 0, 0] * s3[:, None]                               # (Cout, width)

    b1 = bias1.reshape(width, 1)
    b2 = bias2.reshape(width, 1)
    b3 = bias3.reshape(Cout, 1)

    # Per-tap boundary masks for the rolled im2col slab: (27, M), 1.0 where the
    # shifted neighbor (d+kd-1, h+kh-1, w+kw-1) is inside the volume.
    d_idx = jnp.arange(D).reshape(D, 1, 1)
    h_idx = jnp.arange(H).reshape(1, H, 1)
    w_idx = jnp.arange(W).reshape(1, 1, W)
    masks = []
    for kd in range(3):
        for kh in range(3):
            for kw in range(3):
                vd = (d_idx + (kd - 1) >= 0) & (d_idx + (kd - 1) < D)
                vh = (h_idx + (kh - 1) >= 0) & (h_idx + (kh - 1) < H)
                vw = (w_idx + (kw - 1) >= 0) & (w_idx + (kw - 1) < W)
                masks.append((vd & vh & vw).reshape(M))
    mask = jnp.stack(masks, axis=0).astype(jnp.float32)                 # (27, M)

    # Lane-dense (N, C, M) layout: plain reshape of NCDHW, M on the lane axis.
    x_flat = x_ncdhw.reshape(N, Cin, M)

    kernel = _make_bottleneck_kernel(D, H, W, width)

    out_flat = pl.pallas_call(
        kernel,
        out_shape=jax.ShapeDtypeStruct((N, Cout, M), x_ncdhw.dtype),
        grid_spec=pltpu.PrefetchScalarGridSpec(
            num_scalar_prefetch=0,
            grid=(N,),
            in_specs=[
                pl.BlockSpec((1, Cin, M), lambda n: (n, 0, 0)),
                pl.BlockSpec((width, Cin), lambda n: (0, 0)),
                pl.BlockSpec((width, 27 * width), lambda n: (0, 0)),
                pl.BlockSpec((Cout, width), lambda n: (0, 0)),
                pl.BlockSpec((width, 1), lambda n: (0, 0)),
                pl.BlockSpec((width, 1), lambda n: (0, 0)),
                pl.BlockSpec((Cout, 1), lambda n: (0, 0)),
                pl.BlockSpec((27, M), lambda n: (0, 0)),
            ],
            out_specs=pl.BlockSpec((1, Cout, M), lambda n: (n, 0, 0)),
            scratch_shapes=[pltpu.VMEM((27 * width, M), jnp.float32)],
        ),
        # "parallel" lets v7x shard the batch axis across its two TensorCores;
        # neutral on v5e/v6e (single TC).
        compiler_params=pltpu.CompilerParams(
            dimension_semantics=("parallel",)),
    )(x_flat, w1f, w2f, w3f, b1, b2, b3, mask)

    return out_flat.reshape(N, Cout, D, H, W)


def bottleneck_ref(x, params, eps=1e-5):
    """Pure-JAX reference (NCDHW, eval-mode BN) mirroring the PyTorch forward."""
    def conv(x, w, pad):
        return jax.lax.conv_general_dilated(
            x, w, window_strides=(1, 1, 1), padding=pad,
            dimension_numbers=("NCDHW", "OIDHW", "NCDHW"),
            precision=jax.lax.Precision.HIGHEST)

    def bn(x, gamma, beta, mean, var):
        sh = (1, -1, 1, 1, 1)
        return (x - mean.reshape(sh)) / jnp.sqrt(var.reshape(sh) + eps) \
            * gamma.reshape(sh) + beta.reshape(sh)

    out = jax.nn.relu(bn(conv(x, params["w1"], "VALID"), *params["bn1"]))
    out = jax.nn.relu(bn(conv(out, params["w2"], [(1, 1)] * 3), *params["bn2"]))
    out = bn(conv(out, params["w3"], "VALID"), *params["bn3"])
    return jax.nn.relu(out + x)


if __name__ == "__main__":
    key = jax.random.PRNGKey(0)
    # Bottleneck(inplanes=16, planes=4): width = 4, out channels = planes*4 = 16
    N, inplanes, planes = 2, 16, 4
    width = planes
    outplanes = planes * 4
    D = H = W = 8

    ks = jax.random.split(key, 8)
    x = jax.random.normal(ks[0], (N, inplanes, D, H, W), jnp.float32)

    def bn_params(k, c):
        k1, k2, k3, k4 = jax.random.split(k, 4)
        gamma = 1.0 + 0.1 * jax.random.normal(k1, (c,), jnp.float32)
        beta = 0.1 * jax.random.normal(k2, (c,), jnp.float32)
        mean = 0.1 * jax.random.normal(k3, (c,), jnp.float32)
        var = jax.random.uniform(k4, (c,), jnp.float32, minval=0.5, maxval=1.5)
        return (gamma, beta, mean, var)

    params = {
        "w1": 0.2 * jax.random.normal(ks[1], (width, inplanes, 1, 1, 1), jnp.float32),
        "w2": 0.2 * jax.random.normal(ks[2], (width, width, 3, 3, 3), jnp.float32),
        "w3": 0.2 * jax.random.normal(ks[3], (outplanes, width, 1, 1, 1), jnp.float32),
        "bn1": bn_params(ks[4], width),
        "bn2": bn_params(ks[5], width),
        "bn3": bn_params(ks[6], outplanes),
    }

    out = bottleneck_pallas(x, params)
    out = jax.block_until_ready(out)

    ref = bottleneck_ref(x, params)
    assert out.shape == ref.shape == (N, outplanes, D, H, W)
    max_err = float(jnp.max(jnp.abs(out - ref)))
    if max_err > 2e-2:
        raise AssertionError(f"mismatch vs reference, max abs err = {max_err}")

    print("KERNEL_OK")
</pallas_src>

<mosaic_0001>
module attributes {stable_mosaic.version = 11 : i64} {
  func.func @kernel(%arg0: i32, %arg1: memref<1x16x512xf32, #tpu.memory_space<vmem>>, %arg2: memref<4x16xf32, #tpu.memory_space<vmem>>, %arg3: memref<4x108xf32, #tpu.memory_space<vmem>>, %arg4: memref<16x4xf32, #tpu.memory_space<vmem>>, %arg5: memref<4x1xf32, #tpu.memory_space<vmem>>, %arg6: memref<4x1xf32, #tpu.memory_space<vmem>>, %arg7: memref<16x1xf32, #tpu.memory_space<vmem>>, %arg8: memref<27x512xf32, #tpu.memory_space<vmem>>, %arg9: memref<1x16x512xf32, #tpu.memory_space<vmem>>, %arg10: memref<108x512xf32, #tpu.memory_space<vmem>>) attributes {dimension_semantics = [#tpu.dimension_semantics<parallel>], iteration_bounds = array<i64: 2>, scalar_prefetch = 0 : i64, scratch_operands = 1 : i64, tpu.core_type = #tpu.core_type<tc>, window_params = [{transform_indices = @transform_0, window_bounds = array<i64: 1, 16, 512>}, {pipeline_mode = #tpu.pipeline_mode<synchronous>, transform_indices = @transform_1, window_bounds = array<i64: 4, 16>}, {pipeline_mode = #tpu.pipeline_mode<synchronous>, transform_indices = @transform_2, window_bounds = array<i64: 4, 108>}, {pipeline_mode = #tpu.pipeline_mode<synchronous>, transform_indices = @transform_3, window_bounds = array<i64: 16, 4>}, {pipeline_mode = #tpu.pipeline_mode<synchronous>, transform_indices = @transform_4, window_bounds = array<i64: 4, 1>}, {pipeline_mode = #tpu.pipeline_mode<synchronous>, transform_indices = @transform_5, window_bounds = array<i64: 4, 1>}, {pipeline_mode = #tpu.pipeline_mode<synchronous>, transform_indices = @transform_6, window_bounds = array<i64: 16, 1>}, {pipeline_mode = #tpu.pipeline_mode<synchronous>, transform_indices = @transform_7, window_bounds = array<i64: 27, 512>}, {transform_indices = @transform_8, window_bounds = array<i64: 1, 16, 512>}]} {
    %c0 = arith.constant 0 : index
    %c0_0 = arith.constant 0 : index
    %0 = vector.load %arg2[%c0, %c0_0] : memref<4x16xf32, #tpu.memory_space<vmem>>, vector<4x16xf32>
    %c0_1 = arith.constant 0 : index
    %c0_2 = arith.constant 0 : index
    %c0_3 = arith.constant 0 : index
    %1 = vector.load %arg1[%c0_1, %c0_2, %c0_3] : memref<1x16x512xf32, #tpu.memory_space<vmem>>, vector<1x16x512xf32>
    %2 = vector.shape_cast %1 : vector<1x16x512xf32> to vector<16x512xf32>
    %cst = arith.constant dense<0.000000e+00> : vector<4x512xf32>
    %3 = tpu.matmul %0, %2, %cst {dimension_numbers = #tpu.dot_dimension_numbers<[1], [0], [0], [1], [0, 0, 1, 1], [], []>} : vector<4x16xf32>, vector<16x512xf32>, vector<4x512xf32> -> vector<4x512xf32>
    %c0_4 = arith.constant 0 : index
    %c0_5 = arith.constant 0 : index
    %4 = vector.load %arg5[%c0_4, %c0_5] : memref<4x1xf32, #tpu.memory_space<vmem>>, vector<4x1xf32>
    %5 = vector.broadcast %4 : vector<4x1xf32> to vector<4x512xf32>
    %6 = arith.addf %3, %5 : vector<4x512xf32>
    %cst_6 = arith.constant 0.000000e+00 : f32
    %7 = vector.broadcast %cst_6 : f32 to vector<4x512xf32>
    %8 = arith.maximumf %6, %7 : vector<4x512xf32>
    %c73_i32 = arith.constant 73 : i32
    %9 = tpu.dynamic_rotate %8 by %c73_i32 dim 1 : vector<4x512xf32>, i32 -> vector<4x512xf32>
    %c0_7 = arith.constant 0 : index
    %c0_8 = arith.constant 0 : index
    %10 = vector.load %arg8[%c0_7, %c0_8] : memref<27x512xf32, #tpu.memory_space<vmem>>, vector<1x512xf32>
    %11 = vector.broadcast %10 : vector<1x512xf32> to vector<4x512xf32>
    %12 = arith.mulf %9, %11 : vector<4x512xf32>
    %c0_9 = arith.constant 0 : index
    %c0_10 = arith.constant 0 : index
    %13 = vector.load %arg10[%c0_9, %c0_10] : memref<108x512xf32, #tpu.memory_space<vmem>>, vector<4x512xf32>
    tpu.vector_store %arg10[%c0_9, %c0_10], %12 {strides = array<i32>} : memref<108x512xf32, #tpu.memory_space<vmem>>, vector<4x512xf32>,
    %c72_i32 = arith.constant 72 : i32
    %14 = tpu.dynamic_rotate %8 by %c72_i32 dim 1 : vector<4x512xf32>, i32 -> vector<4x512xf32>
    %c1 = arith.constant 1 : index
    %c0_11 = arith.constant 0 : index
    %15 = vector.load %arg8[%c1, %c0_11] : memref<27x512xf32, #tpu.memory_space<vmem>>, vector<1x512xf32>
    %16 = vector.broadcast %15 : vector<1x512xf32> to vector<4x512xf32>
    %17 = arith.mulf %14, %16 : vector<4x512xf32>
    %c4 = arith.constant 4 : index
    %c0_12 = arith.constant 0 : index
    %18 = vector.load %arg10[%c4, %c0_12] : memref<108x512xf32, #tpu.memory_space<vmem>>, vector<4x512xf32>
    tpu.vector_store %arg10[%c4, %c0_12], %17 {strides = array<i32>} : memref<108x512xf32, #tpu.memory_space<vmem>>, vector<4x512xf32>,
    %c71_i32 = arith.constant 71 : i32
    %19 = tpu.dynamic_rotate %8 by %c71_i32 dim 1 : vector<4x512xf32>, i32 -> vector<4x512xf32>
    %c2 = arith.constant 2 : index
    %c0_13 = arith.constant 0 : index
    %20 = vector.load %arg8[%c2, %c0_13] : memref<27x512xf32, #tpu.memory_space<vmem>>, vector<1x512xf32>
    %21 = vector.broadcast %20 : vector<1x512xf32> to vector<4x512xf32>
    %22 = arith.mulf %19, %21 : vector<4x512xf32>
    %c8 = arith.constant 8 : index
    %c0_14 = arith.constant 0 : index
    %23 = vector.load %arg10[%c8, %c0_14] : memref<108x512xf32, #tpu.memory_space<vmem>>, vector<4x512xf32>
    tpu.vector_store %arg10[%c8, %c0_14], %22 {strides = array<i32>} : memref<108x512xf32, #tpu.memory_space<vmem>>, vector<4x512xf32>,
    %c65_i32 = arith.constant 65 : i32
    %24 = tpu.dynamic_rotate %8 by %c65_i32 dim 1 : vector<4x512xf32>, i32 -> vector<4x512xf32>
    %c3 = arith.constant 3 : index
    %c0_15 = arith.constant 0 : index
    %25 = vector.load %arg8[%c3, %c0_15] : memref<27x512xf32, #tpu.memory_space<vmem>>, vector<1x512xf32>
    %26 = vector.broadcast %25 : vector<1x512xf32> to vector<4x512xf32>
    %27 = arith.mulf %24, %26 : vector<4x512xf32>
    %c12 = arith.constant 12 : index
    %c0_16 = arith.constant 0 : index
    %28 = vector.load %arg10[%c12, %c0_16] : memref<108x512xf32, #tpu.memory_space<vmem>>, vector<4x512xf32>
    tpu.vector_store %arg10[%c12, %c0_16], %27 {strides = array<i32>} : memref<108x512xf32, #tpu.memory_space<vmem>>, vector<4x512xf32>,
    %c64_i32 = arith.constant 64 : i32
    %29 = tpu.dynamic_rotate %8 by %c64_i32 dim 1 : vector<4x512xf32>, i32 -> vector<4x512xf32>
    %c4_17 = arith.constant 4 : index
    %c0_18 = arith.constant 0 : index
    %30 = vector.load %arg8[%c4_17, %c0_18] : memref<27x512xf32, #tpu.memory_space<vmem>>, vector<1x512xf32>
    %31 = vector.broadcast %30 : vector<1x512xf32> to vector<4x512xf32>
    %32 = arith.mulf %29, %31 : vector<4x512xf32>
    %c16 = arith.constant 16 : index
    %c0_19 = arith.constant 0 : index
    %33 = vector.load %arg10[%c16, %c0_19] : memref<108x512xf32, #tpu.memory_space<vmem>>, vector<4x512xf32>
    tpu.vector_store %arg10[%c16, %c0_19], %32 {strides = array<i32>} : memref<108x512xf32, #tpu.memory_space<vmem>>, vector<4x512xf32>,
    %c63_i32 = arith.constant 63 : i32
    %34 = tpu.dynamic_rotate %8 by %c63_i32 dim 1 : vector<4x512xf32>, i32 -> vector<4x512xf32>
    %c5 = arith.constant 5 : index
    %c0_20 = arith.constant 0 : index
    %35 = vector.load %arg8[%c5, %c0_20] : memref<27x512xf32, #tpu.memory_space<vmem>>, vector<1x512xf32>
    %36 = vector.broadcast %35 : vector<1x512xf32> to vector<4x512xf32>
    %37 = arith.mulf %34, %36 : vector<4x512xf32>
    %c20 = arith.constant 20 : index
    %c0_21 = arith.constant 0 : index
    %38 = vector.load %arg10[%c20, %c0_21] : memref<108x512xf32, #tpu.memory_space<vmem>>, vector<4x512xf32>
    tpu.vector_store %arg10[%c20, %c0_21], %37 {strides = array<i32>} : memref<108x512xf32, #tpu.memory_space<vmem>>, vector<4x512xf32>,
    %c57_i32 = arith.constant 57 : i32
    %39 = tpu.dynamic_rotate %8 by %c57_i32 dim 1 : vector<4x512xf32>, i32 -> vector<4x512xf32>
    %c6 = arith.constant 6 : index
    %c0_22 = arith.constant 0 : index
    %40 = vector.load %arg8[%c6, %c0_22] : memref<27x512xf32, #tpu.memory_space<vmem>>, vector<1x512xf32>
    %41 = vector.broadcast %40 : vector<1x512xf32> to vector<4x512xf32>
    %42 = arith.mulf %39, %41 : vector<4x512xf32>
    %c24 = arith.constant 24 : index
    %c0_23 = arith.constant 0 : index
    %43 = vector.load %arg10[%c24, %c0_23] : memref<108x512xf32, #tpu.memory_space<vmem>>, vector<4x512xf32>
    tpu.vector_store %arg10[%c24, %c0_23], %42 {strides = array<i32>} : memref<108x512xf32, #tpu.memory_space<vmem>>, vector<4x512xf32>,
    %c56_i32 = arith.constant 56 : i32
    %44 = tpu.dynamic_rotate %8 by %c56_i32 dim 1 : vector<4x512xf32>, i32 -> vector<4x512xf32>
    %c7 = arith.constant 7 : index
    %c0_24 = arith.constant 0 : index
    %45 = vector.load %arg8[%c7, %c0_24] : memref<27x512xf32, #tpu.memory_space<vmem>>, vector<1x512xf32>
    %46 = vector.broadcast %45 : vector<1x512xf32> to vector<4x512xf32>
    %47 = arith.mulf %44, %46 : vector<4x512xf32>
    %c28 = arith.constant 28 : index
    %c0_25 = arith.constant 0 : index
    %48 = vector.load %arg10[%c28, %c0_25] : memref<108x512xf32, #tpu.memory_space<vmem>>, vector<4x512xf32>
    tpu.vector_store %arg10[%c28, %c0_25], %47 {strides = array<i32>} : memref<108x512xf32, #tpu.memory_space<vmem>>, vector<4x512xf32>,
    %c55_i32 = arith.constant 55 : i32
    %49 = tpu.dynamic_rotate %8 by %c55_i32 dim 1 : vector<4x512xf32>, i32 -> vector<4x512xf32>
    %c8_26 = arith.constant 8 : index
    %c0_27 = arith.constant 0 : index
    %50 = vector.load %arg8[%c8_26, %c0_27] : memref<27x512xf32, #tpu.memory_space<vmem>>, vector<1x512xf32>
    %51 = vector.broadcast %50 : vector<1x512xf32> to vector<4x512xf32>
    %52 = arith.mulf %49, %51 : vector<4x512xf32>
    %c32 = arith.constant 32 : index
    %c0_28 = arith.constant 0 : index
    %53 = vector.load %arg10[%c32, %c0_28] : memref<108x512xf32, #tpu.memory_space<vmem>>, vector<4x512xf32>
    tpu.vector_store %arg10[%c32, %c0_28], %52 {strides = array<i32>} : memref<108x512xf32, #tpu.memory_space<vmem>>, vector<4x512xf32>,
    %c9_i32 = arith.constant 9 : i32
    %54 = tpu.dynamic_rotate %8 by %c9_i32 dim 1 : vector<4x512xf32>, i32 -> vector<4x512xf32>
    %c9 = arith.constant 9 : index
    %c0_29 = arith.constant 0 : index
    %55 = vector.load %arg8[%c9, %c0_29] : memref<27x512xf32, #tpu.memory_space<vmem>>, vector<1x512xf32>
    %56 = vector.broadcast %55 : vector<1x512xf32> to vector<4x512xf32>
    %57 = arith.mulf %54, %56 : vector<4x512xf32>
    %c36 = arith.constant 36 : index
    %c0_30 = arith.constant 0 : index
    %58 = vector.load %arg10[%c36, %c0_30] : memref<108x512xf32, #tpu.memory_space<vmem>>, vector<4x512xf32>
    tpu.vector_store %arg10[%c36, %c0_30], %57 {strides = array<i32>} : memref<108x512xf32, #tpu.memory_space<vmem>>, vector<4x512xf32>,
    %c8_i32 = arith.constant 8 : i32
    %59 = tpu.dynamic_rotate %8 by %c8_i32 dim 1 : vector<4x512xf32>, i32 -> vector<4x512xf32>
    %c10 = arith.constant 10 : index
    %c0_31 = arith.constant 0 : index
    %60 = vector.load %arg8[%c10, %c0_31] : memref<27x512xf32, #tpu.memory_space<vmem>>, vector<1x512xf32>
    %61 = vector.broadcast %60 : vector<1x512xf32> to vector<4x512xf32>
    %62 = arith.mulf %59, %61 : vector<4x512xf32>
    %c40 = arith.constant 40 : index
    %c0_32 = arith.constant 0 : index
    %63 = vector.load %arg10[%c40, %c0_32] : memref<108x512xf32, #tpu.memory_space<vmem>>, vector<4x512xf32>
    tpu.vector_store %arg10[%c40, %c0_32], %62 {strides = array<i32>} : memref<108x512xf32, #tpu.memory_space<vmem>>, vector<4x512xf32>,
    %c7_i32 = arith.constant 7 : i32
    %64 = tpu.dynamic_rotate %8 by %c7_i32 dim 1 : vector<4x512xf32>, i32 -> vector<4x512xf32>
    %c11 = arith.constant 11 : index
    %c0_33 = arith.constant 0 : index
    %65 = vector.load %arg8[%c11, %c0_33] : memref<27x512xf32, #tpu.memory_space<vmem>>, vector<1x512xf32>
    %66 = vector.broadcast %65 : vector<1x512xf32> to vector<4x512xf32>
    %67 = arith.mulf %64, %66 : vector<4x512xf32>
    %c44 = arith.constant 44 : index
    %c0_34 = arith.constant 0 : index
    %68 = vector.load %arg10[%c44, %c0_34] : memref<108x512xf32, #tpu.memory_space<vmem>>, vector<4x512xf32>
    tpu.vector_store %arg10[%c44, %c0_34], %67 {strides = array<i32>} : memref<108x512xf32, #tpu.memory_space<vmem>>, vector<4x512xf32>,
    %c1_i32 = arith.constant 1 : i32
    %69 = tpu.dynamic_rotate %8 by %c1_i32 dim 1 : vector<4x512xf32>, i32 -> vector<4x512xf32>
    %c12_35 = arith.constant 12 : index
    %c0_36 = arith.constant 0 : index
    %70 = vector.load %arg8[%c12_35, %c0_36] : memref<27x512xf32, #tpu.memory_space<vmem>>, vector<1x512xf32>
    %71 = vector.broadcast %70 : vector<1x512xf32> to vector<4x512xf32>
    %72 = arith.mulf %69, %71 : vector<4x512xf32>
    %c48 = arith.constant 48 : index
    %c0_37 = arith.constant 0 : index
    %73 = vector.load %arg10[%c48, %c0_37] : memref<108x512xf32, #tpu.memory_space<vmem>>, vector<4x512xf32>
    tpu.vector_store %arg10[%c48, %c0_37], %72 {strides = array<i32>} : memref<108x512xf32, #tpu.memory_space<vmem>>, vector<4x512xf32>,
    %c52 = arith.constant 52 : index
    %c0_38 = arith.constant 0 : index
    %74 = vector.load %arg10[%c52, %c0_38] : memref<108x512xf32, #tpu.memory_space<vmem>>, vector<4x512xf32>
    tpu.vector_store %arg10[%c52, %c0_38], %8 {strides = array<i32>} : memref<108x512xf32, #tpu.memory_space<vmem>>, vector<4x512xf32>,
    %c511_i32 = arith.constant 511 : i32
    %75 = tpu.dynamic_rotate %8 by %c511_i32 dim 1 : vector<4x512xf32>, i32 -> vector<4x512xf32>
    %c14 = arith.constant 14 : index
    %c0_39 = arith.constant 0 : index
    %76 = vector.load %arg8[%c14, %c0_39] : memref<27x512xf32, #tpu.memory_space<vmem>>, vector<1x512xf32>
    %77 = vector.broadcast %76 : vector<1x512xf32> to vector<4x512xf32>
    %78 = arith.mulf %75, %77 : vector<4x512xf32>
    %c56 = arith.constant 56 : index
    %c0_40 = arith.constant 0 : index
    %79 = vector.load %arg10[%c56, %c0_40] : memref<108x512xf32, #tpu.memory_space<vmem>>, vector<4x512xf32>
    tpu.vector_store %arg10[%c56, %c0_40], %78 {strides = array<i32>} : memref<108x512xf32, #tpu.memory_space<vmem>>, vector<4x512xf32>,
    %c505_i32 = arith.constant 505 : i32
    %80 = tpu.dynamic_rotate %8 by %c505_i32 dim 1 : vector<4x512xf32>, i32 -> vector<4x512xf32>
    %c15 = arith.constant 15 : index
    %c0_41 = arith.constant 0 : index
    %81 = vector.load %arg8[%c15, %c0_41] : memref<27x512xf32, #tpu.memory_space<vmem>>, vector<1x512xf32>
    %82 = vector.broadcast %81 : vector<1x512xf32> to vector<4x512xf32>
    %83 = arith.mulf %80, %82 : vector<4x512xf32>
    %c60 = arith.constant 60 : index
    %c0_42 = arith.constant 0 : index
    %84 = vector.load %arg10[%c60, %c0_42] : memref<108x512xf32, #tpu.memory_space<vmem>>, vector<4x512xf32>
    tpu.vector_store %arg10[%c60, %c0_42], %83 {strides = array<i32>} : memref<108x512xf32, #tpu.memory_space<vmem>>, vector<4x512xf32>,
    %c504_i32 = arith.constant 504 : i32
    %85 = tpu.dynamic_rotate %8 by %c504_i32 dim 1 : vector<4x512xf32>, i32 -> vector<4x512xf32>
    %c16_43 = arith.constant 16 : index
    %c0_44 = arith.constant 0 : index
    %86 = vector.load %arg8[%c16_43, %c0_44] : memref<27x512xf32, #tpu.memory_space<vmem>>, vector<1x512xf32>
    %87 = vector.broadcast %86 : vector<1x512xf32> to vector<4x512xf32>
    %88 = arith.mulf %85, %87 : vector<4x512xf32>
    %c64 = arith.constant 64 : index
    %c0_45 = arith.constant 0 : index
    %89 = vector.load %arg10[%c64, %c0_45] : memref<108x512xf32, #tpu.memory_space<vmem>>, vector<4x512xf32>
    tpu.vector_store %arg10[%c64, %c0_45], %88 {strides = array<i32>} : memref<108x512xf32, #tpu.memory_space<vmem>>, vector<4x512xf32>,
    %c503_i32 = arith.constant 503 : i32
    %90 = tpu.dynamic_rotate %8 by %c503_i32 dim 1 : vector<4x512xf32>, i32 -> vector<4x512xf32>
    %c17 = arith.constant 17 : index
    %c0_46 = arith.constant 0 : index
    %91 = vector.load %arg8[%c17, %c0_46] : memref<27x512xf32, #tpu.memory_space<vmem>>, vector<1x512xf32>
    %92 = vector.broadcast %91 : vector<1x512xf32> to vector<4x512xf32>
    %93 = arith.mulf %90, %92 : vector<4x512xf32>
    %c68 = arith.constant 68 : index
    %c0_47 = arith.constant 0 : index
    %94 = vector.load %arg10[%c68, %c0_47] : memref<108x512xf32, #tpu.memory_space<vmem>>, vector<4x512xf32>
    tpu.vector_store %arg10[%c68, %c0_47], %93 {strides = array<i32>} : memref<108x512xf32, #tpu.memory_space<vmem>>, vector<4x512xf32>,
    %c457_i32 = arith.constant 457 : i32
    %95 = tpu.dynamic_rotate %8 by %c457_i32 dim 1 : vector<4x512xf32>, i32 -> vector<4x512xf32>
    %c18 = arith.constant 18 : index
    %c0_48 = arith.constant 0 : index
    %96 = vector.load %arg8[%c18, %c0_48] : memref<27x512xf32, #tpu.memory_space<vmem>>, vector<1x512xf32>
    %97 = vector.broadcast %96 : vector<1x512xf32> to vector<4x512xf32>
    %98 = arith.mulf %95, %97 : vector<4x512xf32>
    %c72 = arith.constant 72 : index
    %c0_49 = arith.constant 0 : index
    %99 = vector.load %arg10[%c72, %c0_49] : memref<108x512xf32, #tpu.memory_space<vmem>>, vector<4x512xf32>
    tpu.vector_store %arg10[%c72, %c0_49], %98 {strides = array<i32>} : memref<108x512xf32, #tpu.memory_space<vmem>>, vector<4x512xf32>,
    %c456_i32 = arith.constant 456 : i32
    %100 = tpu.dynamic_rotate %8 by %c456_i32 dim 1 : vector<4x512xf32>, i32 -> vector<4x512xf32>
    %c19 = arith.constant 19 : index
    %c0_50 = arith.constant 0 : index
    %101 = vector.load %arg8[%c19, %c0_50] : memref<27x512xf32, #tpu.memory_space<vmem>>, vector<1x512xf32>
    %102 = vector.broadcast %101 : vector<1x512xf32> to vector<4x512xf32>
    %103 = arith.mulf %100, %102 : vector<4x512xf32>
    %c76 = arith.constant 76 : index
    %c0_51 = arith.constant 0 : index
    %104 = vector.load %arg10[%c76, %c0_51] : memref<108x512xf32, #tpu.memory_space<vmem>>, vector<4x512xf32>
    tpu.vector_store %arg10[%c76, %c0_51], %103 {strides = array<i32>} : memref<108x512xf32, #tpu.memory_space<vmem>>, vector<4x512xf32>,
    %c455_i32 = arith.constant 455 : i32
    %105 = tpu.dynamic_rotate %8 by %c455_i32 dim 1 : vector<4x512xf32>, i32 -> vector<4x512xf32>
    %c20_52 = arith.constant 20 : index
    %c0_53 = arith.constant 0 : index
    %106 = vector.load %arg8[%c20_52, %c0_53] : memref<27x512xf32, #tpu.memory_space<vmem>>, vector<1x512xf32>
    %107 = vector.broadcast %106 : vector<1x512xf32> to vector<4x512xf32>
    %108 = arith.mulf %105, %107 : vector<4x512xf32>
    %c80 = arith.constant 80 : index
    %c0_54 = arith.constant 0 : index
    %109 = vector.load %arg10[%c80, %c0_54] : memref<108x512xf32, #tpu.memory_space<vmem>>, vector<4x512xf32>
    tpu.vector_store %arg10[%c80, %c0_54], %108 {strides = array<i32>} : memref<108x512xf32, #tpu.memory_space<vmem>>, vector<4x512xf32>,
    %c449_i32 = arith.constant 449 : i32
    %110 = tpu.dynamic_rotate %8 by %c449_i32 dim 1 : vector<4x512xf32>, i32 -> vector<4x512xf32>
    %c21 = arith.constant 21 : index
    %c0_55 = arith.constant 0 : index
    %111 = vector.load %arg8[%c21, %c0_55] : memref<27x512xf32, #tpu.memory_space<vmem>>, vector<1x512xf32>
    %112 = vector.broadcast %111 : vector<1x512xf32> to vector<4x512xf32>
    %113 = arith.mulf %110, %112 : vector<4x512xf32>
    %c84 = arith.constant 84 : index
    %c0_56 = arith.constant 0 : index
    %114 = vector.load %arg10[%c84, %c0_56] : memref<108x512xf32, #tpu.memory_space<vmem>>, vector<4x512xf32>
    tpu.vector_store %arg10[%c84, %c0_56], %113 {strides = array<i32>} : memref<108x512xf32, #tpu.memory_space<vmem>>, vector<4x512xf32>,
    %c448_i32 = arith.constant 448 : i32
    %115 = tpu.dynamic_rotate %8 by %c448_i32 dim 1 : vector<4x512xf32>, i32 -> vector<4x512xf32>
    %c22 = arith.constant 22 : index
    %c0_57 = arith.constant 0 : index
    %116 = vector.load %arg8[%c22, %c0_57] : memref<27x512xf32, #tpu.memory_space<vmem>>, vector<1x512xf32>
    %117 = vector.broadcast %116 : vector<1x512xf32> to vector<4x512xf32>
    %118 = arith.mulf %115, %117 : vector<4x512xf32>
    %c88 = arith.constant 88 : index
    %c0_58 = arith.constant 0 : index
    %119 = vector.load %arg10[%c88, %c0_58] : memref<108x512xf32, #tpu.memory_space<vmem>>, vector<4x512xf32>
    tpu.vector_store %arg10[%c88, %c0_58], %118 {strides = array<i32>} : memref<108x512xf32, #tpu.memory_space<vmem>>, vector<4x512xf32>,
    %c447_i32 = arith.constant 447 : i32
    %120 = tpu.dynamic_rotate %8 by %c447_i32 dim 1 : vector<4x512xf32>, i32 -> vector<4x512xf32>
    %c23 = arith.constant 23 : index
    %c0_59 = arith.constant 0 : index
    %121 = vector.load %arg8[%c23, %c0_59] : memref<27x512xf32, #tpu.memory_space<vmem>>, vector<1x512xf32>
    %122 = vector.broadcast %121 : vector<1x512xf32> to vector<4x512xf32>
    %123 = arith.mulf %120, %122 : vector<4x512xf32>
    %c92 = arith.constant 92 : index
    %c0_60 = arith.constant 0 : index
    %124 = vector.load %arg10[%c92, %c0_60] : memref<108x512xf32, #tpu.memory_space<vmem>>, vector<4x512xf32>
    tpu.vector_store %arg10[%c92, %c0_60], %123 {strides = array<i32>} : memref<108x512xf32, #tpu.memory_space<vmem>>, vector<4x512xf32>,
    %c441_i32 = arith.constant 441 : i32
    %125 = tpu.dynamic_rotate %8 by %c441_i32 dim 1 : vector<4x512xf32>, i32 -> vector<4x512xf32>
    %c24_61 = arith.constant 24 : index
    %c0_62 = arith.constant 0 : index
    %126 = vector.load %arg8[%c24_61, %c0_62] : memref<27x512xf32, #tpu.memory_space<vmem>>, vector<1x512xf32>
    %127 = vector.broadcast %126 : vector<1x512xf32> to vector<4x512xf32>
    %128 = arith.mulf %125, %127 : vector<4x512xf32>
    %c96 = arith.constant 96 : index
    %c0_63 = arith.constant 0 : index
    %129 = vector.load %arg10[%c96, %c0_63] : memref<108x512xf32, #tpu.memory_space<vmem>>, vector<4x512xf32>
    tpu.vector_store %arg10[%c96, %c0_63], %128 {strides = array<i32>} : memref<108x512xf32, #tpu.memory_space<vmem>>, vector<4x512xf32>,
    %c440_i32 = arith.constant 440 : i32
    %130 = tpu.dynamic_rotate %8 by %c440_i32 dim 1 : vector<4x512xf32>, i32 -> vector<4x512xf32>
    %c25 = arith.constant 25 : index
    %c0_64 = arith.constant 0 : index
    %131 = vector.load %arg8[%c25, %c0_64] : memref<27x512xf32, #tpu.memory_space<vmem>>, vector<1x512xf32>
    %132 = vector.broadcast %131 : vector<1x512xf32> to vector<4x512xf32>
    %133 = arith.mulf %130, %132 : vector<4x512xf32>
    %c100 = arith.constant 100 : index
    %c0_65 = arith.constant 0 : index
    %134 = vector.load %arg10[%c100, %c0_65] : memref<108x512xf32, #tpu.memory_space<vmem>>, vector<4x512xf32>
    tpu.vector_store %arg10[%c100, %c0_65], %133 {strides = array<i32>} : memref<108x512xf32, #tpu.memory_space<vmem>>, vector<4x512xf32>,
    %c439_i32 = arith.constant 439 : i32
    %135 = tpu.dynamic_rotate %8 by %c439_i32 dim 1 : vector<4x512xf32>, i32 -> vector<4x512xf32>
    %c26 = arith.constant 26 : index
    %c0_66 = arith.constant 0 : index
    %136 = vector.load %arg8[%c26, %c0_66] : memref<27x512xf32, #tpu.memory_space<vmem>>, vector<1x512xf32>
    %137 = vector.broadcast %136 : vector<1x512xf32> to vector<4x512xf32>
    %138 = arith.mulf %135, %137 : vector<4x512xf32>
    %c104 = arith.constant 104 : index
    %c0_67 = arith.constant 0 : index
    %139 = vector.load %arg10[%c104, %c0_67] : memref<108x512xf32, #tpu.memory_space<vmem>>, vector<4x512xf32>
    tpu.vector_store %arg10[%c104, %c0_67], %138 {strides = array<i32>} : memref<108x512xf32, #tpu.memory_space<vmem>>, vector<4x512xf32>,
    %c0_68 = arith.constant 0 : index
    %c0_69 = arith.constant 0 : index
    %140 = vector.load %arg3[%c0_68, %c0_69] : memref<4x108xf32, #tpu.memory_space<vmem>>, vector<4x108xf32>
    %c0_70 = arith.constant 0 : index
    %c0_71 = arith.constant 0 : index
    %141 = vector.load %arg10[%c0_70, %c0_71] : memref<108x512xf32, #tpu.memory_space<vmem>>, vector<108x512xf32>
    %cst_72 = arith.constant dense<0.000000e+00> : vector<4x512xf32>
    %142 = tpu.matmul %140, %141, %cst_72 {dimension_numbers = #tpu.dot_dimension_numbers<[1], [0], [0], [1], [0, 0, 1, 1], [], []>} : vector<4x108xf32>, vector<108x512xf32>, vector<4x512xf32> -> vector<4x512xf32>
    %c0_73 = arith.constant 0 : index
    %c0_74 = arith.constant 0 : index
    %143 = vector.load %arg6[%c0_73, %c0_74] : memref<4x1xf32, #tpu.memory_space<vmem>>, vector<4x1xf32>
    %144 = vector.broadcast %143 : vector<4x1xf32> to vector<4x512xf32>
    %145 = arith.addf %142, %144 : vector<4x512xf32>
    %cst_75 = arith.constant 0.000000e+00 : f32
    %146 = vector.broadcast %cst_75 : f32 to vector<4x512xf32>
    %147 = arith.maximumf %145, %146 : vector<4x512xf32>
    %c0_76 = arith.constant 0 : index
    %c0_77 = arith.constant 0 : index
    %148 = vector.load %arg4[%c0_76, %c0_77] : memref<16x4xf32, #tpu.memory_space<vmem>>, vector<16x4xf32>
    %cst_78 = arith.constant dense<0.000000e+00> : vector<16x512xf32>
    %149 = tpu.matmul %148, %147, %cst_78 {dimension_numbers = #tpu.dot_dimension_numbers<[1], [0], [0], [1], [0, 0, 1, 1], [], []>} : vector<16x4xf32>, vector<4x512xf32>, vector<16x512xf32> -> vector<16x512xf32>
    %c0_79 = arith.constant 0 : index
    %c0_80 = arith.constant 0 : index
    %150 = vector.load %arg7[%c0_79, %c0_80] : memref<16x1xf32, #tpu.memory_space<vmem>>, vector<16x1xf32>
    %151 = vector.broadcast %150 : vector<16x1xf32> to vector<16x512xf32>
    %152 = arith.addf %149, %151 : vector<16x512xf32>
    %c0_81 = arith.constant 0 : index
    %c0_82 = arith.constant 0 : index
    %c0_83 = arith.constant 0 : index
    %153 = vector.load %arg1[%c0_81, %c0_82, %c0_83] : memref<1x16x512xf32, #tpu.memory_space<vmem>>, vector<1x16x512xf32>
    %154 = vector.shape_cast %153 : vector<1x16x512xf32> to vector<16x512xf32>
    %155 = arith.addf %152, %154 : vector<16x512xf32>
    %cst_84 = arith.constant 0.000000e+00 : f32
    %156 = vector.broadcast %cst_84 : f32 to vector<16x512xf32>
    %157 = arith.maximumf %155, %156 : vector<16x512xf32>
    %c0_85 = arith.constant 0 : index
    %c0_86 = arith.constant 0 : index
    %c0_87 = arith.constant 0 : index
    %158 = vector.load %arg9[%c0_85, %c0_86, %c0_87] : memref<1x16x512xf32, #tpu.memory_space<vmem>>, vector<1x16x512xf32>
    %159 = vector.shape_cast %158 : vector<1x16x512xf32> to vector<16x512xf32>
    %160 = vector.shape_cast %157 : vector<16x512xf32> to vector<1x16x512xf32>
    tpu.vector_store %arg9[%c0_85, %c0_86, %c0_87], %160 {strides = array<i32>} : memref<1x16x512xf32, #tpu.memory_space<vmem>>, vector<1x16x512xf32>,
    return
  }
  func.func @transform_0(%arg0: i32) -> (i32, i32, i32) {
    %c0_i32 = arith.constant 0 : i32
    %c0_i32_0 = arith.constant 0 : i32
    %c0_i32_1 = arith.constant 0 : i32
    return %arg0, %c0_i32, %c0_i32_0 : i32, i32, i32
  }
  func.func @transform_1(%arg0: i32) -> (i32, i32) {
    %c0_i32 = arith.constant 0 : i32
    %c0_i32_0 = arith.constant 0 : i32
    %c0_i32_1 = arith.constant 0 : i32
    return %c0_i32, %c0_i32_0 : i32, i32
  }
  func.func @transform_2(%arg0: i32) -> (i32, i32) {
    %c0_i32 = arith.constant 0 : i32
    %c0_i32_0 = arith.constant 0 : i32
    %c0_i32_1 = arith.constant 0 : i32
    return %c0_i32, %c0_i32_0 : i32, i32
  }
  func.func @transform_3(%arg0: i32) -> (i32, i32) {
    %c0_i32 = arith.constant 0 : i32
    %c0_i32_0 = arith.constant 0 : i32
    %c0_i32_1 = arith.constant 0 : i32
    return %c0_i32, %c0_i32_0 : i32, i32
  }
  func.func @transform_4(%arg0: i32) -> (i32, i32) {
    %c0_i32 = arith.constant 0 : i32
    %c0_i32_0 = arith.constant 0 : i32
    %c0_i32_1 = arith.constant 0 : i32
    return %c0_i32, %c0_i32_0 : i32, i32
  }
  func.func @transform_5(%arg0: i32) -> (i32, i32) {
    %c0_i32 = arith.constant 0 : i32
    %c0_i32_0 = arith.constant 0 : i32
    %c0_i32_1 = arith.constant 0 : i32
    return %c0_i32, %c0_i32_0 : i32, i32
  }
  func.func @transform_6(%arg0: i32) -> (i32, i32) {
    %c0_i32 = arith.constant 0 : i32
    %c0_i32_0 = arith.constant 0 : i32
    %c0_i32_1 = arith.constant 0 : i32
    return %c0_i32, %c0_i32_0 : i32, i32
  }
  func.func @transform_7(%arg0: i32) -> (i32, i32) {
    %c0_i32 = arith.constant 0 : i32
    %c0_i32_0 = arith.constant 0 : i32
    %c0_i32_1 = arith.constant 0 : i32
    return %c0_i32, %c0_i32_0 : i32, i32
  }
  func.func @transform_8(%arg0: i32) -> (i32, i32, i32) {
    %c0_i32 = arith.constant 0 : i32
    %c0_i32_0 = arith.constant 0 : i32
    %c0_i32_1 = arith.constant 0 : i32
    return %arg0, %c0_i32, %c0_i32_0 : i32, i32, i32
  }
}

</mosaic_0001>

<bundles_post_ra>
// kernel: tpu_custom_call.1
= control target key start
LH: loop header
LB: loop body
LE: loop exit
PB: predicated region body
PF: predicated region fallthrough
CT: control target
= control target key end

     0   :  { %13 = vsyncpa [#allocation4], 0  ;;  %s3312_s0 = inlined_call_operand.hbm [shape: f32[2,16,512], index: 0, kind: input, shape index: {}]   ;;  %s3313_s1 = inlined_call_operand.vmem [shape: f32[4,16], index: 1, kind: input, shape index: {}]   ;;  %s3314_s2 = inlined_call_operand.vmem [shape: f32[4,108], index: 2, kind: input, shape index: {}]   ;;  %s3315_s3 = inlined_call_operand.vmem [shape: f32[16,4], index: 3, kind: input, shape index: {}]   ;;  %s3316_s4 = inlined_call_operand.vmem [shape: f32[4,1], index: 4, kind: input, shape index: {}]   ;;  %s3317_s5 = inlined_call_operand.vmem [shape: f32[4,1], index: 5, kind: input, shape index: {}]   ;;  %s3318_s6 = inlined_call_operand.vmem [shape: f32[16,1], index: 6, kind: input, shape index: {}]   ;;  %s3319_s7 = inlined_call_operand.hbm [shape: f32[27,512], index: 7, kind: input, shape index: {}]   ;;  %s3320_s8 = inlined_call_operand.hbm [shape: f32[2,16,512], index: 8, kind: output, shape index: {}]  }
   0x1   :  { %15 = vsyncpa [#allocation4 + $0x1], 0 }
   0x2   :  { %16 = vsyncpa [#allocation7], 0 }
   0x3   :  { %17 = vsyncpa [#allocation5], 0 }
   0x4   :  { %19 = vsyncpa [#allocation5 + $0x1], 0  ;;  %s2621_s27 = smov 0   ;;  %s2623_s28 = smov 0  }
   0x5   :  { %s2625_s29 = smov 0   ;;  %s2627_s30 = smov 0  }
   0x6 LB: > { %s2642_s9 = sadd.s32 4294967295, %s2547_s30   ;;  %s2234_s10 = sadd.s32 4294967294, %s2547_s30   ;;  %s2547_s30 = sphi %s2627_s30, %s3344_s30   ;;  %s2543_s29 = sphi %s2625_s29, %s3347_s29   ;;  %s2539_s28 = sphi %s2623_s28, %s3346_s28   ;;  %s2535_s27 = sphi %s2621_s27, %s3345_s27  }
   0x7   : > { %p45_p0 = scmp.ne.s32.totalorder %s2539_s28, %s2535_s27  ;;  %p3321_p1 = scmp.eq.s32.totalorder %s2642_s9, 0 }
   0x8   : > { %p222_p3 = scmp.eq.s32.totalorder %s2234_s10, 1  ;;  %p2235_p5 = scmp.ge.s32.totalorder %s2547_s30, 1 }
   0x9   : > { %p2651_p4 = por %p3321_p1, %p45_p0  ;;  %p229_p7 = scmp.lt.s32.totalorder %s2547_s30, 3 }
   0xa   : > { %p2656_p6 = por %p222_p3, %p45_p0  ;;  %s2549_s14 = smov [#allocation6]  }
   0xb   : > { %s3327_s11 = scalar_select %p2651_p4, 1, 0 }
   0xc   : > { %s3328_s12 = scalar_select %p2656_p6, 1, 0 }
   0xd   : > { %p2661_p8 = pnand %p2235_p5, %p229_p7  ;;  %s259_s15 = sshll.u32 %s2549_s14, 4  ;;  %s2665_s15 = int_to_ptr.vmem [resolvable:$true] %s259_s15 }
   0xe   : > { %s2677_s17 = sadd.s32 1, %s2547_s30   ;;  %s32_s18 = sadd.s32 1, %s2543_s29 }
   0xf   : > { %s3329_s13 = scalar_select %p2661_p8, 1, 0 }
  0x10   : > { %p2344_p9 = pneg %p2661_p8  ;;  %3331 = sst [smem:[#allocation12_spill]] %s2677_s17 }
  0x11   : > { %s29_s19 = ssub.s32 %s2547_s30, %s2677_s17  ;;  %s2419_s22 = scalar_lea.hbm %s3319_s7, 2048 }
  0x12   : > { %p2672_p11 = pnand %p2344_p9, %p3321_p1  ;;  %p2420_p12 = scmp.ne.s32.totalorder %s3319_s7, %s2419_s22 }
  0x13   : > { %p2426_p5 = scmp.lt.u32.totalorder %s2419_s22, %s3319_s7 }
  0x14   : > { %p2421_p13 = pneg %p2672_p11 }
  0x16   : > { %p2422_p0 = pnand %p2421_p13, %p2420_p12 }
  0x18   : > { %p2423_p3 = pneg %p2422_p0 }
  0x1a   : > { %p2428_p7 = pnand %p2426_p5, %p2423_p3 }
  0x1c   : > { %2431 = shalt.err (!%p2428_p7)
}
  0x1d   : > { %s2432_s10 = scalar_lea.vmem %s2665_s15, 2048  ;;  %p2440_p2 = scmp.lt.s32.totalorder %s2665_s15, %s2665_s15 }
  0x1e   : > { %p2433_p9 = scmp.ne.s32.totalorder %s2665_s15, %s2432_s10  ;;  %p2441_p6 = scmp.lt.s32.totalorder %s2432_s10, %s2432_s10 }
  0x20   : > { %p2435_p10 = pnand %p2433_p9, %p2421_p13  ;;  %p2442_p4 = por %p2441_p6, %p2440_p2 }
  0x22   : > { %p2436_p1 = pneg %p2435_p10 }
  0x24   : > { %p2443_p8 = pnand %p2442_p4, %p2436_p1 }
  0x26   : > { %2446 = shalt.err (!%p2443_p8)
}
  0x27   : > { %s3326_s14 = smov 512   ;;  %s2551_s20 = smov 32  }
  0x28   : > { %2347 = dma.hbm_to_vmem [thread:$0]  (!%p2672_p11), %s3319_s7, 2048, %s2665_s15, [#allocation7], %s3326_s14, %s3326_s14, %s2551_s20  }
  0x29   : > { %p30_p1 = scmp.eq.s32.totalorder %s29_s19, 0  ;;  %p39_p2 = scmp.ne.s32.totalorder %s2543_s29, %s2539_s28 }
  0x2a   : > { %p40_p4 = scmp.eq.s32.totalorder %s2547_s30, 0  ;;  %p2357_p6 = scmp.lt.s32.totalorder %s2547_s30, 2 }
  0x2b   : > { %s2711_s23 = scalar_select %p30_p1, %s2543_s29, %s32_s18  }
  0x2c   : > { %p41_p8 = por %p40_p4, %p39_p2  ;;  %p3332_p10 = scmp.eq.s32.totalorder %s2642_s9, 1 }
  0x2d   : > { %s273_s16 = sand.u32 1, %s2543_s29   ;;  %s2266_s25 = sshll.u32 %s2547_s30, 10 }
  0x2e   : > { %p2715_p12 = por %p3332_p10, %p39_p2  ;;  %s2238_s26 = sshll.u32 %s273_s16, 6 }
  0x2f   : > { %s2724_s21 = scalar_lea.hbm %s3312_s0, %s2266_s25  ;;  %s277_s15 = scalar_lea.vmem [#allocation3], %s2238_s26 }
  0x30   : > { %s284_s18 = sshll.u32 %s277_s15, 4  ;;  %p2726_p11 = pnand %p2357_p6, %p41_p8  ;;  %s2730_s18 = int_to_ptr.vmem [resolvable:$true] %s284_s18 }
  0x31   : > { %s2732_s22 = scalar_lea.sflag [#allocation4], %s273_s16  ;;  %s2447_s14 = scalar_lea.hbm %s2724_s21, 1024 }
  0x32   : > { %p2448_p13 = scmp.ne.s32.totalorder %s2724_s21, %s2447_s14  ;;  %p2449_p0 = pneg %p2726_p11 }
  0x33   : > { %s2452_s26 = scalar_lea.hbm %s3312_s0, 2048  ;;  %p2453_p7 = scmp.lt.u32.totalorder %s2724_s21, %s3312_s0 }
  0x34   : > { %p2450_p3 = pnand %p2449_p0, %p2448_p13  ;;  %p2454_p9 = scmp.lt.u32.totalorder %s2452_s26, %s2447_s14 }
  0x35   : > { %p2456_p2 = scmp.lt.u32.totalorder %s2447_s14, %s2724_s21 }
  0x36   : > { %p2451_p5 = pneg %p2450_p3  ;;  %p2455_p1 = por %p2454_p9, %p2453_p7 }
  0x38   : > { %p2457_p4 = por %p2456_p2, %p2455_p1 }
  0x3a   : > { %p2458_p6 = pnand %p2457_p4, %p2451_p5 }
  0x3c   : > { %2461 = shalt.err (!%p2458_p6)
}
  0x3d   : > { %s2462_s16 = scalar_lea.vmem %s2730_s18, 1024  ;;  %s2552_s17 = smov [#allocation3]  }
  0x3e   : > { %p2463_p8 = scmp.ne.s32.totalorder %s2730_s18, %s2462_s16  ;;  %s2467_s25 = sshll.u32 %s2552_s17, 4  ;;  %s2468_s25 = int_to_ptr.vmem [resolvable:$false] %s2467_s25 }
  0x3f   : > { %s2469_s10 = scalar_lea.vmem %s2468_s25, 2048  ;;  %p2470_p3 = scmp.lt.s32.totalorder %s2730_s18, %s2468_s25 }
  0x40   : > { %p2465_p10 = pnand %p2463_p8, %p2449_p0  ;;  %p2471_p7 = scmp.lt.s32.totalorder %s2469_s10, %s2462_s16 }
  0x42   : > { %p2466_p13 = pneg %p2465_p10  ;;  %p2472_p9 = por %p2471_p7, %p2470_p3 }
  0x44   : > { %p2473_p1 = pnand %p2472_p9, %p2466_p13 }
  0x46   : > { %2476 = shalt.err (!%p2473_p1)
}
  0x47   : > { %s3335_s14 = smov 512   ;;  %p3336_p0 = scmp.ne.s32.totalorder %s3329_s13, 0 }
  0x48   : > { %2351 = dma.hbm_to_vmem [thread:$0]  (!%p2726_p11), %s2724_s21, 1024, %s2730_s18, %s2732_s22, %s3335_s14, %s3335_s14, %s2551_s20  }
  0x49   : > { %296 = sbr.rel (%p3336_p0) target bundleno = 1038 (0x40e), region = 52  ;;  %s2766_s26 = sand.u32 (!%p3336_p0), 1, %s2539_s28  }
  0x4a   : > { %s2242_s15 = sshll.u32 (!%p3336_p0), %s2766_s26, 6  ;;  %s299_s16 = scalar_lea.sflag (!%p3336_p0), [#allocation4], %s2766_s26 }
  0x4b   : > { %s2772_s19 = scalar_lea.vmem (!%p3336_p0), [#allocation3], %s2242_s15  ;;  %p3337_p5 = scmp.ne.s32.totalorder (!%p3336_p0), %s3327_s11, 0 }
  0x50   : > { %2522 = dma.done.wait (%p3337_p5), %s299_s16, 1024  }
  0x51   : > { %2524 = vsyncadd (%p3337_p5), %s299_s16, 4294966272  ;;  %p3338_p11 = scmp.eq.s32.totalorder %s2642_s9, 0 }
  0x53   : > { %2526 = dma.done.wait (%p3338_p11), [#allocation7], 2048   ;;  %p3339_p2 = pmov %p3338_p11 }
  0x54   : > { %v2553_v0 = vmov 0.0   ;;  %v2554_v1 = vmov 0   ;;  %v341_v2 = vld [vmem:[%s2772_s19 + $0x8] sm:$0xff]  ;;  %v343_v4 = vld [vmem:[%s2772_s19 + $0x18] sm:$0xff]  ;;  %v340_v7 = vld [vmem:[%s2772_s19] sm:$0xff]  ;;  %vm354_vm0 = vcmask 130048   ;;  %v512_v33 = vlaneseq }
  0x55   : > { %2528 = vsyncadd (%p3339_p2), [#allocation7], 4294965248  ;;  %422 = vmatprep.mubr.f32.mxu0 %v2553_v0  ;;  %493 = vmatprep.mubr.f32.mxu1 %v2553_v0  ;;  %v345_v3 = vld [vmem:[%s2772_s19 + $0x28] sm:$0xff]  ;;  %v347_v6 = vld [vmem:[%s2772_s19 + $0x38] sm:$0xff]  ;;  %s2555_s18 = smov 72   ;;  %s2556_s22 = smov 65  }
  0x56   : > { %2417 = vset.pattern.permute.xlu0 %v2554_v1  ;;  %2418 = vset.pattern.permute.xlu1 %v2554_v1  ;;  %v2268_v5 = vpack.c.bf16 %v345_v3, %v341_v2  ;;  %v344_v8 = vld [vmem:[%s2772_s19 + $0x20] sm:$0xff]  ;;  %v2272_v9 = vpack.c.bf16 %v347_v6, %v343_v4  ;;  %v342_v11 = vld [vmem:[%s2772_s19 + $0x10] sm:$0xff]  ;;  %s2557_s17 = smov 73   ;;  %s2558_s25 = smov 71   ;;  %v522_v34 = vshrl.u32 %v512_v33, 7  ;;  %v2871_v35 = vand.u32 127, %v512_v33 }
  0x57   : > { %v2270_v10 = vpack.c.bf16 %v344_v8, %v340_v7  ;;  %v346_v12 = vld [vmem:[%s2772_s19 + $0x30] sm:$0xff]  ;;  %v348_v14 = vld [vmem:[%s3316_s4] sm:$0xf]  ;;  %s2559_s10 = smov 63   ;;  %s2560_s14 = smov 56  }
  0x58   : > { %2269 = vmatprep.subr.bf16.mxu0 %v2268_v5  ;;  %v2274_v13 = vpack.c.bf16 %v346_v12, %v342_v11  ;;  %2273 = vmatprep.subr.bf16.mxu1 %v2272_v9  ;;  %v339_v15 = vld [vmem:[%s3313_s1] sm:$0xf]  ;;  %s2561_s16 = smov 64   ;;  %s2562_s11 = smov 57   ;;  %v2874_v36 = vsub.s32 0, %v522_v34  ;;  %v2876_v37 = vsub.s32 2, %v522_v34 }
  0x59   : > { %2271 = vmatpush1.bf16.msra.mxu0 %v2270_v10  ;;  %351 = vperm.xlu0 %2417, %v348_v14   ;;  %s2563_s13 = smov 9   ;;  %s2564_s20 = smov 7   ;;  %v2878_v38 = vsub.s32 3, %v522_v34  ;;  %v2882_v39 = vld [vmem:[#allocation6 + $0x1] ss:$8 sm:$0xf] }
  0x5a   : > { %2275 = vmatpush1.bf16.msra.mxu1 %v2274_v13  ;;  %s2565_s21 = smov 55   ;;  %v2884_v40 = vld [vmem:[#allocation6 + $0x43] ss:$8 sm:$0xf]  ;;  %vm557_vm1 = vcmp.lt.s32.totalorder %v2871_v35, 72  ;;  %v2891_v43 = vsub.s32 1, %v522_v34  ;;  %v568_v44 = vrot.slane %v2882_v39, %v2874_v36 }
  0x5b   : > { %v580_v45 = vrot.slane %v2882_v39, %v2878_v38  ;;  %v1410_v46 = vrot.slane %v2884_v40, %v2876_v37  ;;  %v1414_v47 = vrot.slane %v2884_v40, %v2878_v38  ;;  %v663_v48 = vld [vmem:[#allocation6 + $0x3] ss:$8 sm:$0xf]  ;;  %v1471_v49 = vld [vmem:[#allocation6 + $0x45] ss:$8 sm:$0xf] }
  0x5c   : > { %2245 = vmatmul.mubr.msk.f32.vlgmr.msra.gmra.mrb[0].mxu0 %vm354_vm0, %v339_v15  ;;  %vm657_vm2 = vcmp.lt.s32.totalorder %v2871_v35, 65  ;;  %v672_v54 = vrot.slane %v663_v48, %v2891_v43  ;;  %v1476_v55 = vrot.slane %v1471_v49, %v2874_v36  ;;  %v676_v60 = vrot.slane %v663_v48, %v2876_v37  ;;  %v2921_v9 = vld [vmem:[#allocation6] ss:$8 sm:$0xf] }
  0x5d   : > { %2246 = vmatmul.mubr.msk.f32.vlgmr.msra.gmra.mrb[0].mxu1 %vm354_vm0, %v339_v15  ;;  %1836 = vmatprep.mubr.f32.mxu0 %v2553_v0  ;;  %v1480_v61 = vrot.slane %v1471_v49, %v2891_v43  ;;  %v668_v6 = vrot.slane %v663_v48, %v2874_v36  ;;  %v680_v7 = vrot.slane %v663_v48, %v2878_v38  ;;  %v2923_v10 = vld [vmem:[#allocation6 + $0x42] ss:$8 sm:$0xf]  ;;  %vm514_vm3 = vcmp.lt.s32.totalorder %v2871_v35, 73 }
  0x5e   : > { %1907 = vmatprep.mubr.f32.mxu1 %v2553_v0  ;;  %v1484_v8 = vrot.slane %v1471_v49, %v2876_v37  ;;  %v1488_v14 = vrot.slane %v1471_v49, %v2878_v38  ;;  %vm613_vm4 = vcmp.lt.s32.totalorder %v2871_v35, 71  ;;  %vm757_vm5 = vcmp.lt.s32.totalorder %v2871_v35, 63 }
  0x5f   : > { %vm857_vm6 = vcmp.lt.s32.totalorder %v2871_v35, 56  ;;  %vm713_vm7 = vcmp.lt.s32.totalorder %v2871_v35, 64  ;;  %vm813_vm8 = vcmp.lt.s32.totalorder %v2871_v35, 57  ;;  %vm957_vm9 = vcmp.lt.s32.totalorder %v2871_v35, 9 }
  0x60   : > { %vm1057_vm10 = vcmp.lt.s32.totalorder %v2871_v35, 7  ;;  %vm913_vm11 = vcmp.lt.s32.totalorder %v2871_v35, 55  ;;  %vm1013_vm12 = vcmp.lt.s32.totalorder %v2871_v35, 8  ;;  %vm1217_vm13 = vcmp.lt.s32.totalorder %v2871_v35, 121 }
  0x61   : > { %vm1113_vm14 = vcmp.lt.s32.totalorder %v2871_v35, 1  ;;  %vm1173_vm15 = vcmp.lt.s32.totalorder %v2871_v35, 127  ;;  %vm1317_vm0 = vcmp.lt.s32.totalorder %v2871_v35, 119 }
  0xd8   : > { %v352_v16 = vpop.permute.xlu0 %351 }
 0x12f   : > { %v424_v17 = vpop.f32.mrb[0].mxu0 }
 0x130   : > { %v425_v18 = vadd.f32 %v424_v17, %v352_v16  ;;  %v495_v19 = vpop.f32.mrb[0].mxu1  ;;  %v426_v20 = vpop.f32.mrb[1].mxu0 }
 0x131   : > { %v496_v21 = vadd.f32 %v495_v19, %v352_v16  ;;  %v427_v22 = vadd.f32 %v426_v20, %v352_v16  ;;  %v497_v23 = vpop.f32.mrb[1].mxu1  ;;  %v528_v20 = vrot.slane %v2921_v9, %v2891_v43 }
 0x132   : > { %v2800_v24 = vmax.f32 %v425_v18, 0.0  ;;  %v498_v25 = vadd.f32 %v497_v23, %v352_v16 }
 0x133   : > { %v2802_v26 = vmax.f32 %v496_v21, 0.0  ;;  %v2804_v27 = vmax.f32 %v427_v22, 0.0  ;;  %v1371_v21 = vrot.slane %v2923_v10, %v2874_v36 }
 0x134   : > { %v2806_v28 = vmax.f32 %v498_v25, 0.0  ;;  %549 = vrot.lane.b32.xlu0 %v2800_v24, %s2555_s18  ;;  %v1153_v29 = vrot.slane %v2800_v24, 4 }
 0x135   : > { %553 = vrot.lane.b32.xlu1 %v2802_v26, %s2555_s18  ;;  %v1154_v30 = vrot.slane %v2804_v27, 4  ;;  %v1155_v31 = vrot.slane %v2802_v26, 4 }
 0x136   : > { %1161 = vst [vmem:[#allocation2 + $0xc0] sm:$0xf0] %v1153_v29  ;;  %v1156_v32 = vrot.slane %v2806_v28, 4 }
 0x137   : > { %1162 = vst [vmem:[#allocation2 + $0xc8] sm:$0xf0] %v1154_v30  ;;  %1163 = vst [vmem:[#allocation2 + $0xd0] sm:$0xf0] %v1155_v31 }
 0x138   : > { %555 = vrot.lane.b32.xlu0 %v2806_v28, %s2555_s18  ;;  %1164 = vst [vmem:[#allocation2 + $0xd8] sm:$0xf0] %v1156_v32 }
 0x139   : > { %649 = vrot.lane.b32.xlu1 %v2800_v24, %s2556_s22 }
 0x13c   : > { %651 = vrot.lane.b32.xlu0 %v2804_v27, %s2556_s22 }
 0x13d   : > { %653 = vrot.lane.b32.xlu1 %v2802_v26, %s2556_s22 }
 0x140   : > { %655 = vrot.lane.b32.xlu0 %v2806_v28, %s2556_s22  ;;  %s2566_s22 = smov 8  }
 0x141   : > { %504 = vrot.lane.b32.xlu1 %v2800_v24, %s2557_s17 }
 0x144   : > { %506 = vrot.lane.b32.xlu0 %v2804_v27, %s2557_s17 }
 0x145   : > { %508 = vrot.lane.b32.xlu1 %v2802_v26, %s2557_s17 }
 0x148   : > { %510 = vrot.lane.b32.xlu0 %v2806_v28, %s2557_s17  ;;  %s2567_s17 = smov 121  }
 0x149   : > { %605 = vrot.lane.b32.xlu1 %v2800_v24, %s2558_s25 }
 0x14c   : > { %607 = vrot.lane.b32.xlu0 %v2804_v27, %s2558_s25 }
 0x14d   : > { %609 = vrot.lane.b32.xlu1 %v2802_v26, %s2558_s25 }
 0x150   : > { %611 = vrot.lane.b32.xlu0 %v2806_v28, %s2558_s25  ;;  %s2568_s25 = smov 1  }
 0x151   : > { %749 = vrot.lane.b32.xlu1 %v2800_v24, %s2559_s10 }
 0x154   : > { %751 = vrot.lane.b32.xlu0 %v2804_v27, %s2559_s10 }
 0x155   : > { %753 = vrot.lane.b32.xlu1 %v2802_v26, %s2559_s10 }
 0x158   : > { %755 = vrot.lane.b32.xlu0 %v2806_v28, %s2559_s10  ;;  %s2569_s10 = smov 127  }
 0x159   : > { %849 = vrot.lane.b32.xlu1 %v2800_v24, %s2560_s14 }
 0x15c   : > { %851 = vrot.lane.b32.xlu0 %v2804_v27, %s2560_s14 }
 0x15d   : > { %853 = vrot.lane.b32.xlu1 %v2802_v26, %s2560_s14 }
 0x160   : > { %855 = vrot.lane.b32.xlu0 %v2806_v28, %s2560_s14  ;;  %s2571_s14 = smov 120  }
 0x161   : > { %705 = vrot.lane.b32.xlu1 %v2800_v24, %s2561_s16 }
 0x164   : > { %707 = vrot.lane.b32.xlu0 %v2804_v27, %s2561_s16 }
 0x165   : > { %709 = vrot.lane.b32.xlu1 %v2802_v26, %s2561_s16 }
 0x168   : > { %711 = vrot.lane.b32.xlu0 %v2806_v28, %s2561_s16 }
 0x169   : > { %805 = vrot.lane.b32.xlu1 %v2800_v24, %s2562_s11 }
 0x16c   : > { %807 = vrot.lane.b32.xlu0 %v2804_v27, %s2562_s11 }
 0x16d   : > { %809 = vrot.lane.b32.xlu1 %v2802_v26, %s2562_s11 }
 0x170   : > { %811 = vrot.lane.b32.xlu0 %v2806_v28, %s2562_s11  ;;  %s338_s11 = scalar_lea.vmem [#allocation8], %s2242_s15 }
 0x171   : > { %949 = vrot.lane.b32.xlu1 %v2800_v24, %s2563_s13 }
 0x174   : > { %951 = vrot.lane.b32.xlu0 %v2804_v27, %s2563_s13 }
 0x175   : > { %953 = vrot.lane.b32.xlu1 %v2802_v26, %s2563_s13 }
 0x178   : > { %955 = vrot.lane.b32.xlu0 %v2806_v28, %s2563_s13  ;;  %s2151_s13 = sshll.u32 %s338_s11, 4  ;;  %s3263_s13 = int_to_ptr.vmem [resolvable:$true] %s2151_s13 }
 0x179   : > { %1049 = vrot.lane.b32.xlu1 %v2800_v24, %s2564_s20 }
 0x17c   : > { %1051 = vrot.lane.b32.xlu0 %v2804_v27, %s2564_s20 }
 0x17d   : > { %1053 = vrot.lane.b32.xlu1 %v2802_v26, %s2564_s20 }
 0x180   : > { %1055 = vrot.lane.b32.xlu0 %v2806_v28, %s2564_s20  ;;  %s2267_s20 = sshll.u32 %s2642_s9, 10 }
 0x181   : > { %905 = vrot.lane.b32.xlu1 %v2800_v24, %s2565_s21  ;;  %s3268_s9 = scalar_lea.hbm %s3320_s8, %s2267_s20 }
 0x184   : > { %907 = vrot.lane.b32.xlu0 %v2804_v27, %s2565_s21 }
 0x185   : > { %909 = vrot.lane.b32.xlu1 %v2802_v26, %s2565_s21 }
 0x188   : > { %911 = vrot.lane.b32.xlu0 %v2806_v28, %s2565_s21  ;;  %s2138_s21 = scalar_lea.sflag [#allocation5], %s2766_s26 }
 0x189   : > { %1005 = vrot.lane.b32.xlu1 %v2800_v24, %s2566_s22 }
 0x18c   : > { %1007 = vrot.lane.b32.xlu0 %v2804_v27, %s2566_s22 }
 0x18d   : > { %1009 = vrot.lane.b32.xlu1 %v2802_v26, %s2566_s22 }
 0x190   : > { %1011 = vrot.lane.b32.xlu0 %v2806_v28, %s2566_s22  ;;  %s2477_s22 = scalar_lea.vmem %s3263_s13, 1024 }
 0x191   : > { %1209 = vrot.lane.b32.xlu1 %v2800_v24, %s2567_s17  ;;  %p2478_p4 = scmp.ne.s32.totalorder %s3263_s13, %s2477_s22 }
 0x193   : > { %p2479_p6 = pnand %p2478_p4, %p2715_p12 }
 0x194   : > { %1211 = vrot.lane.b32.xlu0 %v2804_v27, %s2567_s17 }
 0x195   : > { %1213 = vrot.lane.b32.xlu1 %v2802_v26, %s2567_s17  ;;  %p2480_p8 = pneg %p2479_p6 }
 0x198   : > { %1215 = vrot.lane.b32.xlu0 %v2806_v28, %s2567_s17  ;;  %s2573_s17 = smov [#allocation8]  }
 0x199   : > { %1105 = vrot.lane.b32.xlu1 %v2800_v24, %s2568_s25 }
 0x19c   : > { %1107 = vrot.lane.b32.xlu0 %v2804_v27, %s2568_s25 }
 0x19d   : > { %1109 = vrot.lane.b32.xlu1 %v2802_v26, %s2568_s25 }
 0x1a0   : > { %1111 = vrot.lane.b32.xlu0 %v2806_v28, %s2568_s25  ;;  %s2481_s25 = sshll.u32 %s2573_s17, 4  ;;  %s2482_s25 = int_to_ptr.vmem [resolvable:$false] %s2481_s25 }
 0x1a1   : > { %1165 = vrot.lane.b32.xlu1 %v2800_v24, %s2569_s10  ;;  %p2484_p10 = scmp.lt.s32.totalorder %s3263_s13, %s2482_s25 }
 0x1a4   : > { %1167 = vrot.lane.b32.xlu0 %v2804_v27, %s2569_s10 }
 0x1a5   : > { %551 = vrot.lane.b32.xlu1 %v2804_v27, %s2555_s18  ;;  %s2570_s18 = smov 119  }
 0x1a6   : > { %v2886_v41 = vpop.permute.xlu0 %549 }
 0x1a7   : > { %v2888_v42 = vpop.permute.xlu1 %553 }
 0x1a8   : > { %1171 = vrot.lane.b32.xlu0 %v2806_v28, %s2569_s10 }
 0x1a9   : > { %1169 = vrot.lane.b32.xlu1 %v2802_v26, %s2569_s10  ;;  %s2483_s10 = scalar_lea.vmem %s2482_s25, 2048 }
 0x1aa   : > { %v556_v50 = vpop.permute.xlu0 %555  ;;  %p2485_p13 = scmp.lt.s32.totalorder %s2483_s10, %s2477_s22 }
 0x1ab   : > { %v650_v51 = vpop.permute.xlu1 %649  ;;  %v558_v52 = vsel %vm557_vm1, %v2888_v42, %v556_v50  ;;  %v561_v53 = vsel %vm557_vm1, %v556_v50, %v2886_v41 }
 0x1ac   : > { %v585_v56 = vmul.f32 %v568_v44, %v561_v53  ;;  %v588_v57 = vmul.f32 %v580_v45, %v558_v52  ;;  %v1421_v58 = vmul.f32 %v1410_v46, %v558_v52  ;;  %v1422_v59 = vmul.f32 %v1414_v47, %v561_v53  ;;  %1311 = vrot.lane.b32.xlu0 %v2804_v27, %s2570_s18  ;;  %p2486_p3 = por %p2485_p13, %p2484_p10 }
 0x1ad   : > { %1309 = vrot.lane.b32.xlu1 %v2800_v24, %s2570_s18  ;;  %v532_v44 = vrot.slane %v2921_v9, %v2876_v37  ;;  %v1375_v45 = vrot.slane %v2923_v10, %v2891_v43  ;;  %v1379_v53 = vrot.slane %v2923_v10, %v2876_v37 }
 0x1ae   : > { %v593_v62 = vrot.slane %v585_v56, 4  ;;  %v596_v63 = vrot.slane %v588_v57, 4  ;;  %v1429_v1 = vrot.slane %v1421_v58, 4  ;;  %v1430_v2 = vrot.slane %v1422_v59, 4  ;;  %v652_v3 = vpop.permute.xlu0 %651  ;;  %p2487_p7 = pnand %p2486_p3, %p2480_p8 }
 0x1af   : > { %v654_v4 = vpop.permute.xlu1 %653  ;;  %v660_v5 = vsel %vm657_vm2, %v650_v51, %v652_v3  ;;  %v1383_v57 = vrot.slane %v2923_v10, %v2878_v38  ;;  %v619_v58 = vld [vmem:[#allocation6 + $0x2] ss:$8 sm:$0xf]  ;;  %v1440_v59 = vld [vmem:[#allocation6 + $0x44] ss:$8 sm:$0xf] }
 0x1b0   : > { %601 = vst [vmem:[#allocation2] sm:$0xf0] %v593_v62  ;;  %604 = vst [vmem:[#allocation2 + $0x18] sm:$0xf0] %v596_v63  ;;  %v659_v11 = vsel %vm657_vm2, %v652_v3, %v654_v4  ;;  %v686_v12 = vmul.f32 %v672_v54, %v660_v5  ;;  %v1493_v13 = vmul.f32 %v1476_v55, %v660_v5  ;;  %1315 = vrot.lane.b32.xlu0 %v2806_v28, %s2570_s18  ;;  %v1920_v62 = vld [vmem:[%s3318_s6] sm:$0xff] }
 0x1b1   : > { %1437 = vst [vmem:[#allocation2 + $0x130] sm:$0xf0] %v1429_v1  ;;  %1438 = vst [vmem:[#allocation2 + $0x138] sm:$0xf0] %v1430_v2  ;;  %v687_v15 = vmul.f32 %v676_v60, %v659_v11  ;;  %v1494_v16 = vmul.f32 %v1480_v61, %v659_v11  ;;  %1313 = vrot.lane.b32.xlu1 %v2802_v26, %s2570_s18  ;;  %v1445_v3 = vrot.slane %v1440_v59, %v2874_v36 }
 0x1b2   : > { %v694_v17 = vrot.slane %v686_v12, 4  ;;  %v1501_v18 = vrot.slane %v1493_v13, 4  ;;  %v656_v19 = vpop.permute.xlu0 %655  ;;  %v624_v13 = vrot.slane %v619_v58, %v2874_v36 }
 0x1b3   : > { %v695_v22 = vrot.slane %v687_v15, 4  ;;  %v1502_v23 = vrot.slane %v1494_v16, 4  ;;  %v505_v25 = vpop.permute.xlu1 %504  ;;  %v658_v29 = vsel %vm657_vm2, %v654_v4, %v656_v19  ;;  %v661_v30 = vsel %vm657_vm2, %v656_v19, %v650_v51 }
 0x1b4   : > { %702 = vst [vmem:[#allocation2 + $0x28] sm:$0xf0] %v694_v17  ;;  %1509 = vst [vmem:[#allocation2 + $0x140] sm:$0xf0] %v1501_v18  ;;  %v685_v31 = vmul.f32 %v668_v6, %v661_v30  ;;  %v688_v32 = vmul.f32 %v680_v7, %v658_v29  ;;  %v1495_v33 = vmul.f32 %v1484_v8, %v658_v29  ;;  %1267 = vrot.lane.b32.xlu0 %v2804_v27, %s2571_s14  ;;  %vm1759_vm2 = vcmask 1043456  }
 0x1b5   : > { %v1496_v34 = vmul.f32 %v1488_v14, %v661_v30  ;;  %703 = vst [vmem:[#allocation2 + $0x30] sm:$0xf0] %v695_v22  ;;  %1510 = vst [vmem:[#allocation2 + $0x148] sm:$0xf0] %v1502_v23  ;;  %1265 = vrot.lane.b32.xlu1 %v2800_v24, %s2571_s14  ;;  %v524_v27 = vrot.slane %v2921_v9, %v2874_v36  ;;  %v536_v24 = vrot.slane %v2921_v9, %v2878_v38 }
 0x1b6   : > { %v693_v46 = vrot.slane %v685_v31, 4  ;;  %v696_v47 = vrot.slane %v688_v32, 4  ;;  %v1503_v48 = vrot.slane %v1495_v33, 4  ;;  %v507_v50 = vpop.permute.xlu0 %506  ;;  %v632_v8 = vrot.slane %v619_v58, %v2876_v37 }
 0x1b7   : > { %v1504_v49 = vrot.slane %v1496_v34, 4  ;;  %v509_v51 = vpop.permute.xlu1 %508  ;;  %v517_v52 = vsel %vm514_vm3, %v505_v25, %v507_v50  ;;  %v1449_v9 = vrot.slane %v1440_v59, %v2891_v43  ;;  %v636_v14 = vrot.slane %v619_v58, %v2878_v38 }
 0x1b8   : > { %701 = vst [vmem:[#allocation2 + $0x20] sm:$0xf0] %v693_v46  ;;  %704 = vst [vmem:[#allocation2 + $0x38] sm:$0xf0] %v696_v47  ;;  %v516_v54 = vsel %vm514_vm3, %v507_v50, %v509_v51  ;;  %v542_v55 = vmul.f32 %v528_v20, %v517_v52  ;;  %v1388_v56 = vmul.f32 %v1371_v21, %v517_v52  ;;  %1271 = vrot.lane.b32.xlu0 %v2806_v28, %s2571_s14  ;;  %v1749_v50 = vld [vmem:[%s3317_s5] sm:$0xf] }
 0x1b9   : > { %1511 = vst [vmem:[#allocation2 + $0x150] sm:$0xf0] %v1503_v48  ;;  %1512 = vst [vmem:[#allocation2 + $0x158] sm:$0xf0] %v1504_v49  ;;  %v543_v60 = vmul.f32 %v532_v44, %v516_v54  ;;  %v1389_v61 = vmul.f32 %v1375_v45, %v516_v54  ;;  %1269 = vrot.lane.b32.xlu1 %v2802_v26, %s2571_s14  ;;  %v628_v26 = vrot.slane %v619_v58, %v2891_v43 }
 0x1ba   : > { %546 = vst [vmem:[#allocation2 + $0x8] sm:$0xf] %v542_v55  ;;  %1392 = vst [vmem:[#allocation2 + $0x120] sm:$0xf] %v1388_v56  ;;  %v511_v63 = vpop.permute.xlu0 %510  ;;  %v1453_v15 = vrot.slane %v1440_v59, %v2876_v37  ;;  %v1457_v19 = vrot.slane %v1440_v59, %v2878_v38 }
 0x1bb   : > { %547 = vst [vmem:[#allocation2 + $0x10] sm:$0xf] %v543_v60  ;;  %1393 = vst [vmem:[#allocation2 + $0x128] sm:$0xf] %v1389_v61  ;;  %v606_v28 = vpop.permute.xlu1 %605  ;;  %v515_v1 = vsel %vm514_vm3, %v509_v51, %v511_v63  ;;  %v518_v2 = vsel %vm514_vm3, %v511_v63, %v505_v25  ;;  %v1921_v60 = vld [vmem:[%s3318_s6 + $0x8] sm:$0xff]  ;;  %vm2572_vm3 = vmmov 1  }
 0x1bc   : > { %v541_v4 = vmul.f32 %v524_v27, %v518_v2  ;;  %v544_v5 = vmul.f32 %v536_v24, %v515_v1  ;;  %v1390_v6 = vmul.f32 %v1379_v53, %v515_v1  ;;  %v1391_v7 = vmul.f32 %v1383_v57, %v518_v2  ;;  %1924 = vperm.xlu0 %2417, %v1920_v62   ;;  %v763_v20 = vld [vmem:[#allocation6 + $0x5] ss:$8 sm:$0xf]  ;;  %v1545_v21 = vld [vmem:[#allocation6 + $0x47] ss:$8 sm:$0xf] }
 0x1bd   : > { %v772_v32 = vrot.slane %v763_v20, %v2891_v43  ;;  %v1550_v33 = vrot.slane %v1545_v21, %v2874_v36  ;;  %v776_v47 = vrot.slane %v763_v20, %v2876_v37  ;;  %v1554_v48 = vrot.slane %v1545_v21, %v2891_v43  ;;  %v2996_v54 = vld [vmem:[#allocation6 + $0x7] ss:$8 sm:$0xf]  ;;  %v2998_v55 = vld [vmem:[#allocation6 + $0x61] ss:$8 sm:$0xf]  ;;  %1752 = vperm.xlu1 %2418, %v1749_v50  }
 0x1be   : > { %545 = vst [vmem:[#allocation2] sm:$0xf] %v541_v4  ;;  %548 = vst [vmem:[#allocation2 + $0x18] sm:$0xf] %v544_v5  ;;  %v608_v10 = vpop.permute.xlu0 %607  ;;  %v768_v27 = vrot.slane %v763_v20, %v2874_v36  ;;  %v780_v24 = vrot.slane %v763_v20, %v2878_v38  ;;  %v1558_v53 = vrot.slane %v1545_v21, %v2876_v37 }
 0x1bf   : > { %1394 = vst [vmem:[#allocation2 + $0x130] sm:$0xf] %v1390_v6  ;;  %1395 = vst [vmem:[#allocation2 + $0x138] sm:$0xf] %v1391_v7  ;;  %v610_v11 = vpop.permute.xlu1 %609  ;;  %v616_v12 = vsel %vm613_vm4, %v606_v28, %v608_v10  ;;  %v1562_v59 = vrot.slane %v1545_v21, %v2878_v38  ;;  %v872_v2 = vrot.slane %v2996_v54, %v2891_v43 }
 0x1c0   : > { %v615_v16 = vsel %vm613_vm4, %v608_v10, %v610_v11  ;;  %v642_v17 = vmul.f32 %v628_v26, %v616_v12  ;;  %v1462_v18 = vmul.f32 %v1445_v3, %v616_v12  ;;  %v1624_v26 = vrot.slane %v2998_v55, %v2874_v36 }
 0x1c1   : > { %v643_v22 = vmul.f32 %v632_v8, %v615_v16  ;;  %v1463_v23 = vmul.f32 %v1449_v9, %v615_v16  ;;  %1929 = vperm.xlu1 %2418, %v1921_v60   ;;  %v876_v12 = vrot.slane %v2996_v54, %v2876_v37 }
 0x1c2   : > { %646 = vst [vmem:[#allocation2 + $0x28] sm:$0xf] %v642_v17  ;;  %1466 = vst [vmem:[#allocation2 + $0x140] sm:$0xf] %v1462_v18  ;;  %v612_v25 = vpop.permute.xlu0 %611 }
 0x1c3   : > { %647 = vst [vmem:[#allocation2 + $0x30] sm:$0xf] %v643_v22  ;;  %1467 = vst [vmem:[#allocation2 + $0x148] sm:$0xf] %v1463_v23  ;;  %v750_v29 = vpop.permute.xlu1 %749  ;;  %v614_v30 = vsel %vm613_vm4, %v610_v11, %v612_v25  ;;  %v617_v31 = vsel %vm613_vm4, %v612_v25, %v606_v28 }
 0x1c4   : > { %v641_v34 = vmul.f32 %v624_v13, %v617_v31  ;;  %v644_v44 = vmul.f32 %v636_v14, %v614_v30  ;;  %v1464_v45 = vmul.f32 %v1453_v15, %v614_v30  ;;  %v1465_v46 = vmul.f32 %v1457_v19, %v617_v31  ;;  %v3027_v31 = vld [vmem:[#allocation6 + $0x4] ss:$8 sm:$0xf]  ;;  %vm3223_vm4 = vmpackc.low %vm1759_vm2, %vm2572_vm3 }
 0x1c5   : > { %v1628_v13 = vrot.slane %v2998_v55, %v2891_v43  ;;  %v868_v15 = vrot.slane %v2996_v54, %v2874_v36  ;;  %v1696_v21 = vld [vmem:[#allocation2 + $0x18] sm:$0xff]  ;;  %v1632_v30 = vrot.slane %v2998_v55, %v2876_v37  ;;  %v732_v60 = vrot.slane %v3027_v31, %v2876_v37 }
 0x1c6   : > { %645 = vst [vmem:[#allocation2 + $0x20] sm:$0xf] %v641_v34  ;;  %648 = vst [vmem:[#allocation2 + $0x38] sm:$0xf] %v644_v44  ;;  %v752_v49 = vpop.permute.xlu0 %751 }
 0x1c7   : > { %1468 = vst [vmem:[#allocation2 + $0x150] sm:$0xf] %v1464_v45  ;;  %1469 = vst [vmem:[#allocation2 + $0x158] sm:$0xf] %v1465_v46  ;;  %v754_v51 = vpop.permute.xlu1 %753  ;;  %v760_v52 = vsel %vm757_vm5, %v750_v29, %v752_v49  ;;  %v1636_v45 = vrot.slane %v2998_v55, %v2878_v38 }
 0x1c8   : > { %v759_v56 = vsel %vm757_vm5, %v752_v49, %v754_v51  ;;  %v786_v57 = vmul.f32 %v772_v32, %v760_v52  ;;  %v1567_v58 = vmul.f32 %v1550_v33, %v760_v52  ;;  %v3029_v32 = vld [vmem:[#allocation6 + $0x46] ss:$8 sm:$0xf] }
 0x1c9   : > { %v787_v61 = vmul.f32 %v776_v47, %v759_v56  ;;  %v1568_v62 = vmul.f32 %v1554_v48, %v759_v56  ;;  %v1519_v52 = vrot.slane %v3029_v32, %v2874_v36 }
 0x1ca   : > { %v794_v63 = vrot.slane %v786_v57, 4  ;;  %v1575_v28 = vrot.slane %v1567_v58, 4  ;;  %v756_v1 = vpop.permute.xlu0 %755 }
 0x1cb   : > { %v795_v3 = vrot.slane %v787_v61, 4  ;;  %v1576_v4 = vrot.slane %v1568_v62, 4  ;;  %v850_v5 = vpop.permute.xlu1 %849  ;;  %v758_v6 = vsel %vm757_vm5, %v754_v51, %v756_v1  ;;  %v761_v7 = vsel %vm757_vm5, %v756_v1, %v750_v29 }
 0x1cc   : > { %802 = vst [vmem:[#allocation2 + $0x48] sm:$0xf0] %v794_v63  ;;  %1583 = vst [vmem:[#allocation2 + $0x160] sm:$0xf0] %v1575_v28  ;;  %v785_v8 = vmul.f32 %v768_v27, %v761_v7  ;;  %v788_v9 = vmul.f32 %v780_v24, %v758_v6  ;;  %v1569_v10 = vmul.f32 %v1558_v53, %v758_v6  ;;  %vm1755_vm5 = vcmask 883712  }
 0x1cd   : > { %v1570_v11 = vmul.f32 %v1562_v59, %v761_v7  ;;  %803 = vst [vmem:[#allocation2 + $0x50] sm:$0xf0] %v795_v3  ;;  %1584 = vst [vmem:[#allocation2 + $0x168] sm:$0xf0] %v1576_v4  ;;  %v1700_v14 = vld [vmem:[#allocation2 + $0x38] sm:$0xff]  ;;  %v880_v29 = vrot.slane %v2996_v54, %v2878_v38  ;;  %v728_v51 = vrot.slane %v3027_v31, %v2891_v43 }
 0x1ce   : > { %v793_v16 = vrot.slane %v785_v8, 4  ;;  %v796_v17 = vrot.slane %v788_v9, 4  ;;  %v1577_v18 = vrot.slane %v1569_v10, 4  ;;  %v852_v20 = vpop.permute.xlu0 %851  ;;  %v2306_v25 = vpack.c.bf16 %v1700_v14, %v1696_v21 }
 0x1cf   : > { %v1578_v19 = vrot.slane %v1570_v11, 4  ;;  %v854_v22 = vpop.permute.xlu1 %853  ;;  %v860_v23 = vsel %vm857_vm6, %v850_v5, %v852_v20  ;;  %v1523_v61 = vrot.slane %v3029_v32, %v2891_v43  ;;  %v724_v4 = vrot.slane %v3027_v31, %v2874_v36  ;;  %v819_v11 = vld [vmem:[#allocation6 + $0x6] ss:$8 sm:$0xf] }
 0x1d0   : > { %801 = vst [vmem:[#allocation2 + $0x40] sm:$0xf0] %v793_v16  ;;  %804 = vst [vmem:[#allocation2 + $0x58] sm:$0xf0] %v796_v17  ;;  %v859_v33 = vsel %vm857_vm6, %v852_v20, %v854_v22  ;;  %v886_v34 = vmul.f32 %v872_v2, %v860_v23  ;;  %v1641_v44 = vmul.f32 %v1624_v26, %v860_v23  ;;  %2307 = vmatprep.subr.bf16.mxu1 %v2306_v25 }
 0x1d1   : > { %1585 = vst [vmem:[#allocation2 + $0x170] sm:$0xf0] %v1577_v18  ;;  %1586 = vst [vmem:[#allocation2 + $0x178] sm:$0xf0] %v1578_v19  ;;  %v887_v46 = vmul.f32 %v876_v12, %v859_v33  ;;  %v1642_v47 = vmul.f32 %v1628_v13, %v859_v33  ;;  %v1527_v6 = vrot.slane %v3029_v32, %v2876_v37 }
 0x1d2   : > { %v894_v48 = vrot.slane %v886_v34, 4  ;;  %v1649_v49 = vrot.slane %v1641_v44, 4  ;;  %v856_v50 = vpop.permute.xlu0 %855  ;;  %v1531_v10 = vrot.slane %v3029_v32, %v2878_v38  ;;  %v1588_v12 = vld [vmem:[#allocation6 + $0x60] ss:$8 sm:$0xf]  ;;  %v828_v19 = vrot.slane %v819_v11, %v2891_v43 }
 0x1d3   : > { %v895_v27 = vrot.slane %v887_v46, 4  ;;  %v1650_v24 = vrot.slane %v1642_v47, 4  ;;  %v706_v53 = vpop.permute.xlu1 %705  ;;  %v858_v54 = vsel %vm857_vm6, %v854_v22, %v856_v50  ;;  %v861_v55 = vsel %vm857_vm6, %v856_v50, %v850_v5  ;;  %v963_v50 = vld [vmem:[#allocation6 + $0x21] ss:$8 sm:$0xf] }
 0x1d4   : > { %902 = vst [vmem:[#allocation2 + $0x68] sm:$0xf0] %v894_v48  ;;  %1657 = vst [vmem:[#allocation2 + $0x180] sm:$0xf0] %v1649_v49  ;;  %v885_v56 = vmul.f32 %v868_v15, %v861_v55  ;;  %v888_v57 = vmul.f32 %v880_v29, %v858_v54  ;;  %v1643_v58 = vmul.f32 %v1632_v30, %v858_v54  ;;  %vm1932_vm6 = vcmask 31744  }
 0x1d5   : > { %v1644_v59 = vmul.f32 %v1636_v45, %v861_v55  ;;  %903 = vst [vmem:[#allocation2 + $0x70] sm:$0xf0] %v895_v27  ;;  %1658 = vst [vmem:[#allocation2 + $0x188] sm:$0xf0] %v1650_v24  ;;  %v736_v5 = vrot.slane %v3027_v31, %v2878_v38  ;;  %v1593_v20 = vrot.slane %v1588_v12, %v2874_v36 }
 0x1d6   : > { %v893_v62 = vrot.slane %v885_v56, 4  ;;  %v896_v63 = vrot.slane %v888_v57, 4  ;;  %v1651_v28 = vrot.slane %v1643_v58, 4  ;;  %v708_v2 = vpop.permute.xlu0 %707  ;;  %v832_v29 = vrot.slane %v819_v11, %v2876_v37 }
 0x1d7   : > { %v1652_v1 = vrot.slane %v1644_v59, 4  ;;  %v710_v26 = vpop.permute.xlu1 %709  ;;  %v716_v3 = vsel %vm713_vm7, %v706_v53, %v708_v2  ;;  %v1597_v30 = vrot.slane %v1588_v12, %v2891_v43  ;;  %v824_v34 = vrot.slane %v819_v11, %v2874_v36 }
 0x1d8   : > { %901 = vst [vmem:[#allocation2 + $0x60] sm:$0xf0] %v893_v62  ;;  %904 = vst [vmem:[#allocation2 + $0x78] sm:$0xf0] %v896_v63  ;;  %v715_v7 = vsel %vm713_vm7, %v708_v2, %v710_v26  ;;  %v742_v8 = vmul.f32 %v728_v51, %v716_v3  ;;  %v1536_v9 = vmul.f32 %v1519_v52, %v716_v3 }
 0x1d9   : > { %1659 = vst [vmem:[#allocation2 + $0x190] sm:$0xf0] %v1651_v28  ;;  %1660 = vst [vmem:[#allocation2 + $0x198] sm:$0xf0] %v1652_v1  ;;  %v743_v13 = vmul.f32 %v732_v60, %v715_v7  ;;  %v1537_v14 = vmul.f32 %v1523_v61, %v715_v7  ;;  %v836_v44 = vrot.slane %v819_v11, %v2878_v38 }
 0x1da   : > { %746 = vst [vmem:[#allocation2 + $0x48] sm:$0xf] %v742_v8  ;;  %1540 = vst [vmem:[#allocation2 + $0x160] sm:$0xf] %v1536_v9  ;;  %v712_v15 = vpop.permute.xlu0 %711  ;;  %v1601_v45 = vrot.slane %v1588_v12, %v2876_v37  ;;  %v1605_v49 = vrot.slane %v1588_v12, %v2878_v38  ;;  %v972_v55 = vrot.slane %v963_v50, %v2891_v43 }
 0x1db   : > { %747 = vst [vmem:[#allocation2 + $0x50] sm:$0xf] %v743_v13  ;;  %1541 = vst [vmem:[#allocation2 + $0x168] sm:$0xf] %v1537_v14  ;;  %v806_v16 = vpop.permute.xlu1 %805  ;;  %v714_v17 = vsel %vm713_vm7, %v710_v26, %v712_v15  ;;  %v717_v18 = vsel %vm713_vm7, %v712_v15, %v706_v53  ;;  %v976_v60 = vrot.slane %v963_v50, %v2876_v37 }
 0x1dc   : > { %v741_v21 = vmul.f32 %v724_v4, %v717_v18  ;;  %v744_v22 = vmul.f32 %v736_v5, %v714_v17  ;;  %v1538_v23 = vmul.f32 %v1527_v6, %v714_v17  ;;  %v1539_v25 = vmul.f32 %v1531_v10, %v717_v18  ;;  %v1063_v4 = vld [vmem:[#allocation6 + $0x23] ss:$8 sm:$0xf] }
 0x1dd   : > { %v968_v2 = vrot.slane %v963_v50, %v2874_v36  ;;  %v980_v26 = vrot.slane %v963_v50, %v2878_v38  ;;  %v1072_v13 = vrot.slane %v1063_v4, %v2891_v43  ;;  %v1076_v14 = vrot.slane %v1063_v4, %v2876_v37 }
 0x1de   : > { %745 = vst [vmem:[#allocation2 + $0x40] sm:$0xf] %v741_v21  ;;  %748 = vst [vmem:[#allocation2 + $0x58] sm:$0xf] %v744_v22  ;;  %v808_v31 = vpop.permute.xlu0 %807  ;;  %v1068_v22 = vrot.slane %v1063_v4, %v2874_v36 }
 0x1df   : > { %1542 = vst [vmem:[#allocation2 + $0x170] sm:$0xf] %v1538_v23  ;;  %1543 = vst [vmem:[#allocation2 + $0x178] sm:$0xf] %v1539_v25  ;;  %v810_v32 = vpop.permute.xlu1 %809  ;;  %v816_v33 = vsel %vm813_vm8, %v806_v16, %v808_v31  ;;  %v1080_v23 = vrot.slane %v1063_v4, %v2878_v38 }
 0x1e0   : > { %v815_v46 = vsel %vm813_vm8, %v808_v31, %v810_v32  ;;  %v842_v47 = vmul.f32 %v828_v19, %v816_v33  ;;  %v1610_v48 = vmul.f32 %v1593_v20, %v816_v33 }
 0x1e1   : > { %v843_v51 = vmul.f32 %v832_v29, %v815_v46  ;;  %v1611_v52 = vmul.f32 %v1597_v30, %v815_v46  ;;  %v919_v29 = vld [vmem:[#allocation6 + $0x20] ss:$8 sm:$0xf]  ;;  %v1662_v30 = vld [vmem:[#allocation6 + $0x62] ss:$8 sm:$0xf] }
 0x1e2   : > { %846 = vst [vmem:[#allocation2 + $0x68] sm:$0xf] %v842_v47  ;;  %1614 = vst [vmem:[#allocation2 + $0x180] sm:$0xf] %v1610_v48  ;;  %v812_v27 = vpop.permute.xlu0 %811  ;;  %v928_v48 = vrot.slane %v919_v29, %v2891_v43  ;;  %v932_v50 = vrot.slane %v919_v29, %v2876_v37 }
 0x1e3   : > { %847 = vst [vmem:[#allocation2 + $0x70] sm:$0xf] %v843_v51  ;;  %1615 = vst [vmem:[#allocation2 + $0x188] sm:$0xf] %v1611_v52  ;;  %v950_v24 = vpop.permute.xlu1 %949  ;;  %v814_v53 = vsel %vm813_vm8, %v810_v32, %v812_v27  ;;  %v817_v54 = vsel %vm813_vm8, %v812_v27, %v806_v16  ;;  %v1671_v51 = vrot.slane %v1662_v30, %v2891_v43 }
 0x1e4   : > { %v841_v56 = vmul.f32 %v824_v34, %v817_v54  ;;  %v844_v57 = vmul.f32 %v836_v44, %v814_v53  ;;  %v1612_v58 = vmul.f32 %v1601_v45, %v814_v53  ;;  %v1613_v59 = vmul.f32 %v1605_v49, %v817_v54 }
 0x1e5   : > { %v1667_v49 = vrot.slane %v1662_v30, %v2874_v36 }
 0x1e6   : > { %845 = vst [vmem:[#allocation2 + $0x60] sm:$0xf] %v841_v56  ;;  %848 = vst [vmem:[#allocation2 + $0x78] sm:$0xf] %v844_v57  ;;  %v952_v61 = vpop.permute.xlu0 %951  ;;  %v936_v56 = vrot.slane %v919_v29, %v2878_v38  ;;  %v1675_v57 = vrot.slane %v1662_v30, %v2876_v37 }
 0x1e7   : > { %1616 = vst [vmem:[#allocation2 + $0x190] sm:$0xf] %v1612_v58  ;;  %1617 = vst [vmem:[#allocation2 + $0x198] sm:$0xf] %v1613_v59  ;;  %v954_v62 = vpop.permute.xlu1 %953  ;;  %v960_v63 = vsel %vm957_vm9, %v950_v24, %v952_v61 }
 0x1e8   : > { %v959_v28 = vsel %vm957_vm9, %v952_v61, %v954_v62  ;;  %v986_v1 = vmul.f32 %v972_v55, %v960_v63  ;;  %v924_v55 = vrot.slane %v919_v29, %v2874_v36  ;;  %v1679_v61 = vrot.slane %v1662_v30, %v2878_v38 }
 0x1e9   : > { %v987_v3 = vmul.f32 %v976_v60, %v959_v28 }
 0x1ea   : > { %v994_v5 = vrot.slane %v986_v1, 4  ;;  %v956_v6 = vpop.permute.xlu0 %955 }
 0x1eb   : > { %v995_v7 = vrot.slane %v987_v3, 4  ;;  %v1050_v8 = vpop.permute.xlu1 %1049  ;;  %v958_v9 = vsel %vm957_vm9, %v954_v62, %v956_v6  ;;  %v961_v10 = vsel %vm957_vm9, %v956_v6, %v950_v24  ;;  %v1019_v62 = vld [vmem:[#allocation6 + $0x22] ss:$8 sm:$0xf] }
 0x1ec   : > { %1002 = vst [vmem:[#allocation2 + $0x88] sm:$0xf0] %v994_v5  ;;  %v985_v11 = vmul.f32 %v968_v2, %v961_v10  ;;  %v988_v12 = vmul.f32 %v980_v26, %v958_v9  ;;  %v1028_v4 = vrot.slane %v1019_v62, %v2891_v43  ;;  %v1032_v9 = vrot.slane %v1019_v62, %v2876_v37 }
 0x1ed   : > { %1003 = vst [vmem:[#allocation2 + $0x90] sm:$0xf0] %v995_v7 }
 0x1ee   : > { %v993_v15 = vrot.slane %v985_v11, 4  ;;  %v996_v16 = vrot.slane %v988_v12, 4  ;;  %v1052_v17 = vpop.permute.xlu0 %1051 }
 0x1ef   : > { %v1054_v18 = vpop.permute.xlu1 %1053  ;;  %v1060_v19 = vsel %vm1057_vm10, %v1050_v8, %v1052_v17 }
 0x1f0   : > { %1001 = vst [vmem:[#allocation2 + $0x80] sm:$0xf0] %v993_v15  ;;  %1004 = vst [vmem:[#allocation2 + $0x98] sm:$0xf0] %v996_v16  ;;  %v1059_v20 = vsel %vm1057_vm10, %v1052_v17, %v1054_v18  ;;  %v1086_v21 = vmul.f32 %v1072_v13, %v1060_v19  ;;  %v1024_v15 = vrot.slane %v1019_v62, %v2874_v36 }
 0x1f1   : > { %v1087_v25 = vmul.f32 %v1076_v14, %v1059_v20  ;;  %v1036_v16 = vrot.slane %v1019_v62, %v2878_v38 }
 0x1f2   : > { %v1094_v31 = vrot.slane %v1086_v21, 4  ;;  %v1056_v32 = vpop.permute.xlu0 %1055 }
 0x1f3   : > { %v1095_v33 = vrot.slane %v1087_v25, 4  ;;  %v906_v34 = vpop.permute.xlu1 %905  ;;  %v1058_v44 = vsel %vm1057_vm10, %v1054_v18, %v1056_v32  ;;  %v1061_v45 = vsel %vm1057_vm10, %v1056_v32, %v1050_v8  ;;  %v1223_v18 = vld [vmem:[#allocation6 + $0x27] ss:$8 sm:$0xf] }
 0x1f4   : > { %1102 = vst [vmem:[#allocation2 + $0xa8] sm:$0xf0] %v1094_v31  ;;  %v1085_v46 = vmul.f32 %v1068_v22, %v1061_v45  ;;  %v1088_v47 = vmul.f32 %v1080_v23, %v1058_v44  ;;  %v1228_v29 = vrot.slane %v1223_v18, %v2874_v36  ;;  %v1232_v30 = vrot.slane %v1223_v18, %v2891_v43 }
 0x1f5   : > { %1103 = vst [vmem:[#allocation2 + $0xb0] sm:$0xf0] %v1095_v33  ;;  %v1236_v45 = vrot.slane %v1223_v18, %v2876_v37 }
 0x1f6   : > { %v1093_v52 = vrot.slane %v1085_v46, 4  ;;  %v1096_v27 = vrot.slane %v1088_v47, 4  ;;  %v908_v24 = vpop.permute.xlu0 %907  ;;  %v1240_v46 = vrot.slane %v1223_v18, %v2878_v38 }
 0x1f7   : > { %v910_v53 = vpop.permute.xlu1 %909  ;;  %v916_v54 = vsel %vm913_vm11, %v906_v34, %v908_v24 }
 0x1f8   : > { %1101 = vst [vmem:[#allocation2 + $0xa0] sm:$0xf0] %v1093_v52  ;;  %1104 = vst [vmem:[#allocation2 + $0xb8] sm:$0xf0] %v1096_v27  ;;  %v915_v58 = vsel %vm913_vm11, %v908_v24, %v910_v53  ;;  %v942_v59 = vmul.f32 %v928_v48, %v916_v54  ;;  %v1684_v60 = vmul.f32 %v1667_v49, %v916_v54 }
 0x1f9   : > { %v943_v63 = vmul.f32 %v932_v50, %v915_v58  ;;  %v1685_v28 = vmul.f32 %v1671_v51, %v915_v58  ;;  %v1119_v48 = vld [vmem:[#allocation6 + $0x24] ss:$8 sm:$0xf] }
 0x1fa   : > { %946 = vst [vmem:[#allocation2 + $0x88] sm:$0xf] %v942_v59  ;;  %1688 = vst [vmem:[#allocation2 + $0x1a0] sm:$0xf] %v1684_v60  ;;  %v912_v1 = vpop.permute.xlu0 %911 }
 0x1fb   : > { %947 = vst [vmem:[#allocation2 + $0x90] sm:$0xf] %v943_v63  ;;  %1689 = vst [vmem:[#allocation2 + $0x1a8] sm:$0xf] %v1685_v28  ;;  %v1006_v2 = vpop.permute.xlu1 %1005  ;;  %v914_v26 = vsel %vm913_vm11, %v910_v53, %v912_v1  ;;  %v917_v3 = vsel %vm913_vm11, %v912_v1, %v906_v34  ;;  %v1124_v28 = vrot.slane %v1119_v48, %v2874_v36 }
 0x1fc   : > { %v941_v5 = vmul.f32 %v924_v55, %v917_v3  ;;  %v944_v6 = vmul.f32 %v936_v56, %v914_v26  ;;  %v1686_v7 = vmul.f32 %v1675_v57, %v914_v26  ;;  %v1687_v8 = vmul.f32 %v1679_v61, %v917_v3  ;;  %v1179_v26 = vld [vmem:[#allocation6 + $0x26] ss:$8 sm:$0xf] }
 0x1fd   : > { %v1128_v55 = vrot.slane %v1119_v48, %v2891_v43  ;;  %v1132_v56 = vrot.slane %v1119_v48, %v2876_v37  ;;  %v1136_v1 = vrot.slane %v1119_v48, %v2878_v38  ;;  %v1192_v18 = vrot.slane %v1179_v26, %v2876_v37 }
 0x1fe   : > { %945 = vst [vmem:[#allocation2 + $0x80] sm:$0xf] %v941_v5  ;;  %948 = vst [vmem:[#allocation2 + $0x98] sm:$0xf] %v944_v6  ;;  %v1008_v10 = vpop.permute.xlu0 %1007 }
 0x1ff   : > { %1690 = vst [vmem:[#allocation2 + $0x1b0] sm:$0xf] %v1686_v7  ;;  %1691 = vst [vmem:[#allocation2 + $0x1b8] sm:$0xf] %v1687_v8  ;;  %v1010_v11 = vpop.permute.xlu1 %1009  ;;  %v1016_v12 = vsel %vm1013_vm12, %v1006_v2, %v1008_v10 }
 0x200   : > { %v1015_v13 = vsel %vm1013_vm12, %v1008_v10, %v1010_v11  ;;  %v1042_v14 = vmul.f32 %v1028_v4, %v1016_v12  ;;  %v572_v10 = vrot.slane %v2882_v39, %v2891_v43  ;;  %v1402_v12 = vrot.slane %v2884_v40, %v2874_v36 }
 0x201   : > { %v1043_v17 = vmul.f32 %v1032_v9, %v1015_v13  ;;  %v1184_v9 = vrot.slane %v1179_v26, %v2874_v36  ;;  %v1406_v13 = vrot.slane %v2884_v40, %v2891_v43 }
 0x202   : > { %1046 = vst [vmem:[#allocation2 + $0xa8] sm:$0xf] %v1042_v14  ;;  %v1012_v19 = vpop.permute.xlu0 %1011 }
 0x203   : > { %1047 = vst [vmem:[#allocation2 + $0xb0] sm:$0xf] %v1043_v17  ;;  %v1210_v20 = vpop.permute.xlu1 %1209  ;;  %v1014_v21 = vsel %vm1013_vm12, %v1010_v11, %v1012_v19  ;;  %v1017_v22 = vsel %vm1013_vm12, %v1012_v19, %v1006_v2  ;;  %v576_v11 = vrot.slane %v2882_v39, %v2876_v37  ;;  %v1188_v17 = vrot.slane %v1179_v26, %v2891_v43 }
 0x204   : > { %v1041_v23 = vmul.f32 %v1024_v15, %v1017_v22  ;;  %v1044_v25 = vmul.f32 %v1036_v16, %v1014_v21 }
 0x206   : > { %1045 = vst [vmem:[#allocation2 + $0xa0] sm:$0xf] %v1041_v23  ;;  %1048 = vst [vmem:[#allocation2 + $0xb8] sm:$0xf] %v1044_v25  ;;  %v1212_v31 = vpop.permute.xlu0 %1211 }
 0x207   : > { %v1214_v32 = vpop.permute.xlu1 %1213  ;;  %v1220_v33 = vsel %vm1217_vm13, %v1210_v20, %v1212_v31 }
 0x208   : > { %v1219_v34 = vsel %vm1217_vm13, %v1212_v31, %v1214_v32  ;;  %v1245_v44 = vmul.f32 %v1228_v29, %v1220_v33 }
 0x209   : > { %v1246_v47 = vmul.f32 %v1232_v30, %v1219_v34  ;;  %v1323_v30 = vld [vmem:[#allocation6 + $0x41] ss:$8 sm:$0xf] }
 0x20a   : > { %v1253_v49 = vrot.slane %v1245_v44, 4  ;;  %v1216_v50 = vpop.permute.xlu0 %1215 }
 0x20b   : > { %v1254_v51 = vrot.slane %v1246_v47, 4  ;;  %v1106_v52 = vpop.permute.xlu1 %1105  ;;  %v1218_v27 = vsel %vm1217_vm13, %v1214_v32, %v1216_v50  ;;  %v1221_v24 = vsel %vm1217_vm13, %v1216_v50, %v1210_v20  ;;  %v1196_v20 = vrot.slane %v1179_v26, %v2878_v38 }
 0x20c   : > { %1261 = vst [vmem:[#allocation2 + $0xe0] sm:$0xf0] %v1253_v49  ;;  %v1247_v53 = vmul.f32 %v1236_v45, %v1218_v27  ;;  %v1248_v54 = vmul.f32 %v1240_v46, %v1221_v24  ;;  %v1328_v49 = vrot.slane %v1323_v30, %v2874_v36  ;;  %v1340_v27 = vrot.slane %v1323_v30, %v2878_v38 }
 0x20d   : > { %1262 = vst [vmem:[#allocation2 + $0xe8] sm:$0xf0] %v1254_v51 }
 0x20e   : > { %v1255_v57 = vrot.slane %v1247_v53, 4  ;;  %v1256_v58 = vrot.slane %v1248_v54, 4  ;;  %v1108_v59 = vpop.permute.xlu0 %1107  ;;  %v1332_v53 = vrot.slane %v1323_v30, %v2891_v43  ;;  %v1336_v54 = vrot.slane %v1323_v30, %v2876_v37 }
 0x20f   : > { %v1110_v60 = vpop.permute.xlu1 %1109  ;;  %v1116_v61 = vsel %vm1113_vm14, %v1106_v52, %v1108_v59 }
 0x210   : > { %1263 = vst [vmem:[#allocation2 + $0xf0] sm:$0xf0] %v1255_v57  ;;  %1264 = vst [vmem:[#allocation2 + $0xf8] sm:$0xf0] %v1256_v58  ;;  %v1115_v62 = vsel %vm1113_vm14, %v1108_v59, %v1110_v60  ;;  %v1142_v63 = vmul.f32 %v1128_v55, %v1116_v61  ;;  %v1698_v57 = vld [vmem:[#allocation2 + $0x28] sm:$0xff]  ;;  %v1699_v61 = vld [vmem:[#allocation2 + $0x30] sm:$0xff] }
 0x211   : > { %v1143_v2 = vmul.f32 %v1132_v56, %v1115_v62  ;;  %v3197_v55 = vld [vmem:[#allocation6 + $0x40] ss:$8 sm:$0xf] }
 0x212   : > { %1146 = vst [vmem:[#allocation2 + $0xc8] sm:$0xf] %v1142_v63  ;;  %v1112_v3 = vpop.permute.xlu0 %1111  ;;  %v1697_v62 = vld [vmem:[#allocation2 + $0x20] sm:$0xff]  ;;  %v1708_v63 = vld [vmem:[#allocation2 + $0x78] sm:$0xff]  ;;  %v1288_v30 = vrot.slane %v3197_v55, %v2891_v43 }
 0x213   : > { %1147 = vst [vmem:[#allocation2 + $0xd0] sm:$0xf] %v1143_v2  ;;  %v1166_v4 = vpop.permute.xlu1 %1165  ;;  %v1114_v5 = vsel %vm1113_vm14, %v1110_v60, %v1112_v3  ;;  %v1117_v6 = vsel %vm1113_vm14, %v1112_v3, %v1106_v52 }
 0x214   : > { %v1141_v7 = vmul.f32 %v1124_v28, %v1117_v6  ;;  %v1144_v8 = vmul.f32 %v1136_v1, %v1114_v5  ;;  %v1706_v5 = vld [vmem:[#allocation2 + $0x68] sm:$0xff] }
 0x216   : > { %1145 = vst [vmem:[#allocation2 + $0xc0] sm:$0xf] %v1141_v7  ;;  %1148 = vst [vmem:[#allocation2 + $0xd8] sm:$0xf] %v1144_v8  ;;  %v1168_v14 = vpop.permute.xlu0 %1167 }
 0x217   : > { %v552_v15 = vpop.permute.xlu1 %551  ;;  %v1176_v16 = vsel %vm1173_vm15, %v1166_v4, %v1168_v14 }
 0x218   : > { %v559_v39 = vsel %vm557_vm1, %v552_v15, %v2888_v42  ;;  %v560_v19 = vsel %vm557_vm1, %v2886_v41, %v552_v15  ;;  %v1201_v40 = vmul.f32 %v1184_v9, %v1176_v16  ;;  %vm1273_vm1 = vcmp.lt.s32.totalorder %v2871_v35, 120  ;;  %v1702_v16 = vld [vmem:[#allocation2 + $0x48] sm:$0xff] }
 0x219   : > { %v586_v21 = vmul.f32 %v572_v10, %v560_v19  ;;  %v587_v22 = vmul.f32 %v576_v11, %v559_v39  ;;  %v1419_v23 = vmul.f32 %v1402_v12, %v560_v19  ;;  %v1420_v25 = vmul.f32 %v1406_v13, %v559_v39  ;;  %v1693_v10 = vld [vmem:[#allocation2] sm:$0xff]  ;;  %v1704_v11 = vld [vmem:[#allocation2 + $0x58] sm:$0xff] }
 0x21a   : > { %1205 = vst [vmem:[#allocation2 + $0xe0] sm:$0xf] %v1201_v40  ;;  %v1172_v29 = vpop.permute.xlu0 %1171  ;;  %v2310_v15 = vpack.c.bf16 %v1708_v63, %v1704_v11  ;;  %v1705_v40 = vld [vmem:[#allocation2 + $0x60] sm:$0xff] }
 0x21b   : > { %v594_v31 = vrot.slane %v586_v21, 4  ;;  %v595_v32 = vrot.slane %v587_v22, 4  ;;  %v1427_v33 = vrot.slane %v1419_v23, 4  ;;  %v1428_v34 = vrot.slane %v1420_v25, 4  ;;  %v1170_v44 = vpop.permute.xlu1 %1169  ;;  %v1703_v22 = vld [vmem:[#allocation2 + $0x50] sm:$0xff]  ;;  %v1714_v25 = vld [vmem:[#allocation2 + $0xa8] sm:$0xff] }
 0x21c   : > { %v1175_v42 = vsel %vm1173_vm15, %v1168_v14, %v1170_v44  ;;  %v1174_v41 = vsel %vm1173_vm15, %v1170_v44, %v1172_v29  ;;  %v1177_v45 = vsel %vm1173_vm15, %v1172_v29, %v1166_v4  ;;  %v1284_v4 = vrot.slane %v3197_v55, %v2874_v36 }
 0x21d   : > { %602 = vst [vmem:[#allocation2 + $0x8] sm:$0xf0] %v594_v31  ;;  %603 = vst [vmem:[#allocation2 + $0x10] sm:$0xf0] %v595_v32  ;;  %v1202_v46 = vmul.f32 %v1188_v17, %v1175_v42  ;;  %v1203_v47 = vmul.f32 %v1192_v18, %v1174_v41  ;;  %v1204_v48 = vmul.f32 %v1196_v20, %v1177_v45  ;;  %v1707_v17 = vld [vmem:[#allocation2 + $0x70] sm:$0xff]  ;;  %v1716_v20 = vld [vmem:[#allocation2 + $0xb8] sm:$0xff] }
 0x21e   : > { %1435 = vst [vmem:[#allocation2 + $0x120] sm:$0xf0] %v1427_v33  ;;  %1436 = vst [vmem:[#allocation2 + $0x128] sm:$0xf0] %v1428_v34  ;;  %v1312_v50 = vpop.permute.xlu0 %1311  ;;  %v2278_v14 = vpack.c.bf16 %v1697_v62, %v1693_v10  ;;  %v2280_v36 = vpack.c.bf16 %v1706_v5, %v1702_v16  ;;  %v1296_v23 = vrot.slane %v3197_v55, %v2878_v38  ;;  %v1701_v33 = vld [vmem:[#allocation2 + $0x40] sm:$0xff]  ;;  %v1712_v34 = vld [vmem:[#allocation2 + $0x98] sm:$0xff] }
 0x21f   : > { %1206 = vst [vmem:[#allocation2 + $0xe8] sm:$0xf] %v1202_v46  ;;  %1207 = vst [vmem:[#allocation2 + $0xf0] sm:$0xf] %v1203_v47  ;;  %v1310_v51 = vpop.permute.xlu1 %1309  ;;  %v2312_v31 = vpack.c.bf16 %v1707_v17, %v1703_v22  ;;  %v1292_v32 = vrot.slane %v3197_v55, %v2876_v37  ;;  %v2282_v42 = vpack.c.bf16 %v1705_v40, %v1701_v33  ;;  %v1710_v45 = vld [vmem:[#allocation2 + $0x88] sm:$0xff]  ;;  %v1715_v46 = vld [vmem:[#allocation2 + $0xb0] sm:$0xff] }
 0x220   : > { %1208 = vst [vmem:[#allocation2 + $0xf8] sm:$0xf] %v1204_v48  ;;  %v1320_v52 = vsel %vm1317_vm0, %v1310_v51, %v1312_v50  ;;  %v2314_v41 = vpack.c.bf16 %v1716_v20, %v1712_v34  ;;  %v2284_v48 = vpack.c.bf16 %v1714_v25, %v1710_v45  ;;  %v1709_v55 = vld [vmem:[#allocation2 + $0x80] sm:$0xff]  ;;  %v1719_v62 = vld [vmem:[#allocation2 + $0xd0] sm:$0xff]  ;;  %v1734_v16 = vld [vmem:[#allocation2 + $0x148] sm:$0xff] }
 0x221   : > { %v1345_v24 = vmul.f32 %v1328_v49, %v1320_v52  ;;  %v1713_v49 = vld [vmem:[#allocation2 + $0xa0] sm:$0xff]  ;;  %v1711_v52 = vld [vmem:[#allocation2 + $0x90] sm:$0xff]  ;;  %v1746_v20 = vld [vmem:[#allocation2 + $0x1a8] sm:$0xf] }
 0x222   : > { %v1316_v56 = vpop.permute.xlu0 %1315  ;;  %v1735_v40 = vld [vmem:[#allocation2 + $0x150] sm:$0xff]  ;;  %v1744_v25 = vld [vmem:[#allocation2 + $0x198] sm:$0xff]  ;;  %v1745_v34 = vld [vmem:[#allocation2 + $0x1a0] sm:$0xf] }
 0x223   : > { %v1353_v58 = vrot.slane %v1345_v24, 4  ;;  %v1314_v59 = vpop.permute.xlu1 %1313  ;;  %v1321_v60 = vsel %vm1317_vm0, %v1316_v56, %v1310_v51 }
 0x224   : > { %v1319_v28 = vsel %vm1317_vm0, %v1312_v50, %v1314_v59  ;;  %v1318_v1 = vsel %vm1317_vm0, %v1314_v59, %v1316_v56  ;;  %v1348_v2 = vmul.f32 %v1340_v27, %v1321_v60  ;;  %v1694_v26 = vld [vmem:[#allocation2 + $0x8] sm:$0xff]  ;;  %v1695_v3 = vld [vmem:[#allocation2 + $0x10] sm:$0xff]  ;;  %v1720_v56 = vld [vmem:[#allocation2 + $0xd8] sm:$0xff] }
 0x225   : > { %1361 = vst [vmem:[#allocation2 + $0x100] sm:$0xf0] %v1353_v58  ;;  %v1346_v6 = vmul.f32 %v1332_v53, %v1319_v28  ;;  %v1347_v7 = vmul.f32 %v1336_v54, %v1318_v1  ;;  %v2276_v8 = vpack.c.bf16 %v1698_v57, %v1694_v26  ;;  %v2308_v9 = vpack.c.bf16 %v1699_v61, %v1695_v3  ;;  %v1718_v59 = vld [vmem:[#allocation2 + $0xc8] sm:$0xff]  ;;  %v1721_v61 = vld [vmem:[#allocation2 + $0xe0] sm:$0xff]  ;;  %v1731_v26 = vld [vmem:[#allocation2 + $0x130] sm:$0xff] }
 0x226   : > { %v1356_v12 = vrot.slane %v1348_v2, 4  ;;  %v1268_v13 = vpop.permute.xlu0 %1267  ;;  %v1722_v27 = vld [vmem:[#allocation2 + $0xe8] sm:$0xff]  ;;  %v2316_v54 = vpack.c.bf16 %v1715_v46, %v1711_v52  ;;  %v2286_v57 = vpack.c.bf16 %v1713_v49, %v1709_v55  ;;  %v1723_v60 = vld [vmem:[#allocation2 + $0xf0] sm:$0xff]  ;;  %v1717_v28 = vld [vmem:[#allocation2 + $0xc0] sm:$0xff] }
 0x227   : > { %v1354_v18 = vrot.slane %v1346_v6, 4  ;;  %v1355_v39 = vrot.slane %v1347_v7, 4  ;;  %v1266_v19 = vpop.permute.xlu1 %1265  ;;  %2277 = vmatprep.subr.bf16.mxu0 %v2276_v8  ;;  %2309 = vmatpush1.bf16.msra.mxu1 %v2308_v9  ;;  %v1724_v43 = vld [vmem:[#allocation2 + $0xf8] sm:$0xff]  ;;  %v2288_v35 = vpack.c.bf16 %v1722_v27, %v1718_v59  ;;  %v2320_v63 = vpack.c.bf16 %v1723_v60, %v1719_v62  ;;  %v1738_v3 = vld [vmem:[#allocation2 + $0x168] sm:$0xff]  ;;  %v1692_v46 = vld [vmem:[%s3314_s2] sm:$0xf] }
 0x228   : > { %1364 = vst [vmem:[#allocation2 + $0x118] sm:$0xf0] %v1356_v12  ;;  %v1276_v21 = vsel %vm1273_vm1, %v1266_v19, %v1268_v13  ;;  %2279 = vmatpush1.bf16.msra.mxu0 %v2278_v14  ;;  %2311 = vmatprep.subr.bf16.mxu1 %v2310_v15  ;;  %v2318_v58 = vpack.c.bf16 %v1724_v43, %v1720_v56  ;;  %v1732_v2 = vld [vmem:[#allocation2 + $0x138] sm:$0xff]  ;;  %v1730_v8 = vld [vmem:[#allocation2 + $0x128] sm:$0xff]  ;;  %v1729_v12 = vld [vmem:[#allocation2 + $0x120] sm:$0xff] }
 0x229   : > { %1362 = vst [vmem:[#allocation2 + $0x108] sm:$0xf0] %v1354_v18  ;;  %1363 = vst [vmem:[#allocation2 + $0x110] sm:$0xf0] %v1355_v39  ;;  %v1301_v29 = vmul.f32 %v1284_v4, %v1276_v21  ;;  %2281 = vmatprep.subr.bf16.mxu0 %v2280_v36  ;;  %v2290_v1 = vpack.c.bf16 %v1721_v61, %v1717_v28  ;;  %v1740_v6 = vld [vmem:[#allocation2 + $0x178] sm:$0xff]  ;;  %v1739_v18 = vld [vmem:[#allocation2 + $0x170] sm:$0xff]  ;;  %v2296_v39 = vpack.c.bf16 %v1738_v3, %v1734_v16 }
 0x22a   : > { %v1272_v44 = vpop.permute.xlu0 %1271  ;;  %v1736_v14 = vld [vmem:[#allocation2 + $0x158] sm:$0xff]  ;;  %v1733_v21 = vld [vmem:[#allocation2 + $0x140] sm:$0xff]  ;;  %v2328_v22 = vpack.c.bf16 %v1739_v18, %v1735_v40  ;;  %v1919_v56 = vld [vmem:[%s3315_s3 + $0x8] sm:$0xff] }
 0x22b   : > { %1305 = vst [vmem:[#allocation2 + $0x100] sm:$0xf] %v1301_v29  ;;  %v1270_v38 = vpop.permute.xlu1 %1269  ;;  %2313 = vmatpush1.bf16.msra.mxu1 %v2312_v31  ;;  %v1277_v47 = vsel %vm1273_vm1, %v1272_v44, %v1266_v19  ;;  %v2326_v17 = vpack.c.bf16 %v1740_v6, %v1736_v14  ;;  %v1737_v19 = vld [vmem:[#allocation2 + $0x160] sm:$0xff]  ;;  %v1748_v36 = vld [vmem:[#allocation2 + $0x1b8] sm:$0xf]  ;;  %v2107_v59 = vld [vmem:[%s2772_s19 + $0x10] sm:$0xff] }
 0x22c   : > { %v1275_v50 = vsel %vm1273_vm1, %v1268_v13, %v1270_v38  ;;  %v1274_v37 = vsel %vm1273_vm1, %v1270_v38, %v1272_v44  ;;  %v1304_v51 = vmul.f32 %v1296_v23, %v1277_v47  ;;  %2283 = vmatpush1.bf16.msra.mxu0 %v2282_v42  ;;  %2315 = vmatprep.subr.bf16.mxu1 %v2314_v41  ;;  %v1743_v44 = vld [vmem:[#allocation2 + $0x190] sm:$0xff]  ;;  %v1741_v42 = vld [vmem:[#allocation2 + $0x180] sm:$0xff] }
 0x22d   : > { %v1302_v24 = vmul.f32 %v1288_v30, %v1275_v50  ;;  %v1303_v53 = vmul.f32 %v1292_v32, %v1274_v37  ;;  %2285 = vmatprep.subr.bf16.mxu0 %v2284_v48  ;;  %v2298_v29 = vpack.c.bf16 %v1737_v19, %v1733_v21  ;;  %v1742_v30 = vld [vmem:[#allocation2 + $0x188] sm:$0xff]  ;;  %v2330_v31 = vpack.c.bf16 %v1748_v36, %v1744_v25  ;;  %v1747_v32 = vld [vmem:[#allocation2 + $0x1b0] sm:$0xf] }
 0x22e   : > { %1308 = vst [vmem:[#allocation2 + $0x118] sm:$0xf] %v1304_v51  ;;  %v2300_v33 = vpack.c.bf16 %v1746_v20, %v1742_v30  ;;  %v2333_v41 = vpack.c.bf16 %v1747_v32, %v1743_v44  ;;  %v2303_v45 = vpack.c.bf16 %v1745_v34, %v1741_v42  ;;  %v2110_v19 = vld [vmem:[%s2772_s19 + $0x28] sm:$0xff] }
 0x22f   : > { %1306 = vst [vmem:[#allocation2 + $0x108] sm:$0xf] %v1302_v24  ;;  %1307 = vst [vmem:[#allocation2 + $0x110] sm:$0xf] %v1303_v53  ;;  %2317 = vmatpush1.bf16.msra.mxu1 %v2316_v54  ;;  %v1918_v54 = vld [vmem:[%s3315_s3] sm:$0xff] }
 0x230   : > { %2287 = vmatpush1.bf16.msra.mxu0 %v2286_v57  ;;  %2319 = vmatprep.subr.bf16.mxu1 %v2318_v58 }
 0x231   : > { %2289 = vmatprep.subr.bf16.mxu0 %v2288_v35  ;;  %v2105_v35 = vld [vmem:[%s2772_s19] sm:$0xff] }
 0x232   : > { %v1725_v5 = vld [vmem:[#allocation2 + $0x100] sm:$0xff] }
 0x233   : > { %2321 = vmatpush1.bf16.msra.mxu1 %v2320_v63  ;;  %v2294_v15 = vpack.c.bf16 %v1729_v12, %v1725_v5  ;;  %v2108_v63 = vld [vmem:[%s2772_s19 + $0x18] sm:$0xff]  ;;  %v2109_v12 = vld [vmem:[%s2772_s19 + $0x20] sm:$0xff] }
 0x234   : > { %2291 = vmatpush1.bf16.msra.mxu0 %v2290_v1 }
 0x235   : > { %v1728_v4 = vld [vmem:[#allocation2 + $0x118] sm:$0xff] }
 0x236   : > { %v1726_v7 = vld [vmem:[#allocation2 + $0x108] sm:$0xff]  ;;  %v2322_v9 = vpack.c.bf16 %v1732_v2, %v1728_v4  ;;  %v1727_v10 = vld [vmem:[#allocation2 + $0x110] sm:$0xff] }
 0x237   : > { %v2292_v11 = vpack.c.bf16 %v1730_v8, %v1726_v7  ;;  %v2324_v13 = vpack.c.bf16 %v1731_v26, %v1727_v10  ;;  %v2106_v2 = vld [vmem:[%s2772_s19 + $0x8] sm:$0xff]  ;;  %v2111_v8 = vld [vmem:[%s2772_s19 + $0x30] sm:$0xff] }
 0x238   : > { %2323 = vmatprep.subr.bf16.mxu1 %v2322_v9 }
 0x239   : > { %2293 = vmatprep.subr.bf16.mxu0 %v2292_v11  ;;  %2325 = vmatpush1.bf16.msra.mxu1 %v2324_v13 }
 0x23a   : > { %2295 = vmatpush1.bf16.msra.mxu0 %v2294_v15  ;;  %2327 = vmatprep.subr.bf16.mxu1 %v2326_v17  ;;  %v2112_v15 = vld [vmem:[%s2772_s19 + $0x38] sm:$0xff] }
 0x23b   : > { %2297 = vmatprep.subr.bf16.mxu0 %v2296_v39  ;;  %v1925_v57 = vpop.permute.xlu0 %1924 }
 0x23c   : > { %v1753_v38 = vpop.permute.xlu1 %1752 }
 0x23d   : > { %2329 = vmatpush1.bf16.msra.mxu1 %v2328_v22 }
 0x23e   : > { %2299 = vmatpush1.bf16.msra.mxu0 %v2298_v29  ;;  %2332 = vmatprep.subr.msk.bf16.mxu1 %vm3223_vm4, %v2330_v31 }
 0x23f   : > { %2302 = vmatprep.subr.msk.bf16.mxu0 %vm3223_vm4, %v2300_v33 }
 0x240   : > { %v1930_v4 = vpop.permute.xlu1 %1929 }
 0x241   : > { %2335 = vmatpush1.bf16.msk.msra.mxu1 %vm3223_vm4, %v2333_v41 }
 0x242   : > { %2305 = vmatpush1.bf16.msk.msra.mxu0 %vm3223_vm4, %v2303_v45 }
 0x244   : > { %2252 = vmatmul.mubr.msk.f32.vlgmr.msra.gmra.mrb[2].mxu1 %vm1755_vm5, %v1692_v46 }
 0x245   : > { %2249 = vmatmul.mubr.msk.f32.vlgmr.msra.gmra.mrb[2].mxu0 %vm1755_vm5, %v1692_v46  ;;  %2092 = vmatprep.mubr.f32.mxu1 %v2553_v0 }
 0x246   : > { %2015 = vmatprep.mubr.f32.mxu0 %v2553_v0 }
 0x317   : > { %v1909_v47 = vpop.f32.mrb[2].mxu1 }
 0x318   : > { %v1838_v48 = vpop.f32.mrb[2].mxu0  ;;  %v1910_v49 = vadd.f32 %v1909_v47, %v1753_v38  ;;  %v1911_v43 = vpop.f32.mrb[3].mxu1 }
 0x319   : > { %v1839_v50 = vadd.f32 %v1838_v48, %v1753_v38  ;;  %v1840_v37 = vpop.f32.mrb[3].mxu0  ;;  %v1912_v51 = vadd.f32 %v1911_v43, %v1753_v38 }
 0x31a   : > { %v1841_v52 = vadd.f32 %v1840_v37, %v1753_v38  ;;  %v1916_v24 = vmax.f32 %v1910_v49, 0.0 }
 0x31b   : > { %v1917_v27 = vmax.f32 %v1912_v51, 0.0  ;;  %v1914_v55 = vmax.f32 %v1839_v50, 0.0 }
 0x31c   : > { %v1915_v53 = vmax.f32 %v1841_v52, 0.0 }
 0x31d   : > { %2257 = vmatprep.subr.msk.mxu1 %vm1759_vm2, %v1917_v27 }
 0x31e   : > { %2253 = vmatprep.subr.msk.mxu0 %vm1759_vm2, %v1915_v53  ;;  %2258 = vmatpush1.msk.msra.mxu1 %vm1759_vm2, %v1916_v24 }
 0x31f   : > { %2254 = vmatpush1.msk.msra.mxu0 %vm1759_vm2, %v1914_v55  ;;  %2259 = vmatmul.mubr.msk.f32.vlgmr.msra.gmra.mrb[4].mxu1 %vm1932_vm6, %v1918_v54 }
 0x320   : > { %2255 = vmatmul.mubr.msk.f32.vlgmr.msra.gmra.mrb[4].mxu0 %vm1932_vm6, %v1918_v54  ;;  %2098 = vmatprep.mubr.f32.mxu1 %v2553_v0 }
 0x321   : > { %2021 = vmatprep.mubr.f32.mxu0 %v2553_v0 }
 0x323   : > { %2260 = vmatmul.mubr.msk.f32.gmra.mrb[6].mxu1 %vm1932_vm6, %v1919_v56 }
 0x324   : > { %2256 = vmatmul.mubr.msk.f32.gmra.mrb[6].mxu0 %vm1932_vm6, %v1919_v56 }
 0x3f2   : > { %v2094_v58 = vpop.f32.mrb[4].mxu1 }
 0x3f3   : > { %v2017_v60 = vpop.f32.mrb[4].mxu0  ;;  %v2095_v61 = vadd.f32 %v2094_v58, %v1925_v57  ;;  %v2096_v62 = vpop.f32.mrb[5].mxu1 }
 0x3f4   : > { %v2018_v28 = vadd.f32 %v2017_v60, %v1925_v57  ;;  %v2019_v1 = vpop.f32.mrb[5].mxu0  ;;  %v2097_v26 = vadd.f32 %v2096_v62, %v1925_v57 }
 0x3f5   : > { %v2115_v3 = vadd.f32 %v2107_v59, %v2095_v61  ;;  %v2020_v0 = vadd.f32 %v2019_v1, %v1925_v57 }
 0x3f6   : > { %v2113_v5 = vadd.f32 %v2105_v35, %v2018_v28  ;;  %v2116_v6 = vadd.f32 %v2108_v63, %v2097_v26  ;;  %v2100_v7 = vpop.f32.mrb[6].mxu1 }
 0x3f7   : > { %v2123_v9 = vmax.f32 %v2115_v3, 0.0  ;;  %v2114_v10 = vadd.f32 %v2106_v2, %v2020_v0  ;;  %v2023_v11 = vpop.f32.mrb[6].mxu0  ;;  %v2101_v13 = vadd.f32 %v2100_v7, %v1930_v4  ;;  %v2102_v14 = vpop.f32.mrb[7].mxu1 }
 0x3f8   : > { %v2121_v16 = vmax.f32 %v2113_v5, 0.0  ;;  %v2124_v17 = vmax.f32 %v2116_v6, 0.0  ;;  %v2024_v18 = vadd.f32 %v2023_v11, %v1930_v4  ;;  %v2025_v39 = vpop.f32.mrb[7].mxu0  ;;  %v2103_v36 = vadd.f32 %v2102_v14, %v1930_v4 }
 0x3f9   : > { %2131 = vst [vmem:[%s338_s11 + $0x10] sm:$0xff] %v2123_v9  ;;  %v2122_v40 = vmax.f32 %v2114_v10, 0.0  ;;  %v2119_v20 = vadd.f32 %v2111_v8, %v2101_v13  ;;  %v2026_v21 = vadd.f32 %v2025_v39, %v1930_v4 }
 0x3fa   : > { %2129 = vst [vmem:[%s338_s11] sm:$0xff] %v2121_v16  ;;  %2132 = vst [vmem:[%s338_s11 + $0x18] sm:$0xff] %v2124_v17  ;;  %v2117_v22 = vadd.f32 %v2109_v12, %v2024_v18  ;;  %v2120_v23 = vadd.f32 %v2112_v15, %v2103_v36 }
 0x3fb   : > { %2130 = vst [vmem:[%s338_s11 + $0x8] sm:$0xff] %v2122_v40  ;;  %v2127_v25 = vmax.f32 %v2119_v20, 0.0  ;;  %v2118_v29 = vadd.f32 %v2110_v19, %v2026_v21 }
 0x3fc   : > { %v2125_v30 = vmax.f32 %v2117_v22, 0.0  ;;  %v2128_v31 = vmax.f32 %v2120_v23, 0.0 }
 0x3fd   : > { %2135 = vst [vmem:[%s338_s11 + $0x30] sm:$0xff] %v2127_v25  ;;  %v2126_v32 = vmax.f32 %v2118_v29, 0.0 }
 0x3fe   : > { %2133 = vst [vmem:[%s338_s11 + $0x20] sm:$0xff] %v2125_v30  ;;  %2136 = vst [vmem:[%s338_s11 + $0x38] sm:$0xff] %v2128_v31 }
 0x3ff   : > { %2134 = vst [vmem:[%s338_s11 + $0x28] sm:$0xff] %v2126_v32 }
 0x400   : > { %2490 = shalt.err (!%p2487_p7)
}
 0x401   : > { %s2491_s18 = scalar_lea.hbm %s3268_s9, 1024  ;;  %s2495_s11 = scalar_lea.hbm %s3320_s8, 2048 }
 0x402   : > { %p2492_p9 = scmp.ne.s32.totalorder %s3268_s9, %s2491_s18  ;;  %p2496_p5 = scmp.lt.u32.totalorder %s3268_s9, %s3320_s8 }
 0x403   : > { %p2497_p11 = scmp.lt.u32.totalorder %s2495_s11, %s2491_s18  ;;  %p2499_p4 = scmp.lt.u32.totalorder %s2491_s18, %s3268_s9 }
 0x404   : > { %p2493_p1 = pnand %p2492_p9, %p2715_p12 }
 0x405   : > { %p2498_p2 = por %p2497_p11, %p2496_p5 }
 0x406   : > { %p2494_p0 = pneg %p2493_p1 }
 0x407   : > { %p2500_p6 = por %p2499_p4, %p2498_p2 }
 0x409   : > { %p2501_p8 = pnand %p2500_p6, %p2494_p0 }
 0x40b   : > { %2504 = shalt.err (!%p2501_p8)
}
 0x40c   : > { %s2574_s19 = smov 512   ;;  %s2575_s22 = smov 32  }
 0x40d   : > { %2342 = dma.vmem_to_hbm [thread:$0]  (%p2715_p12), %s3263_s13, 1024, %s3268_s9, %s2138_s21, %s2574_s19, %s2574_s19, %s2575_s22  }
 0x40e PF: > { %s2166_s17 = sand.u32 1, %s2535_s27   ;;  %p3342_p10 = scmp.ne.s32.totalorder %s3328_s12, 0 }
 0x40f   : > { %p3343_p13 = scmp.ge.s32.totalorder %s2547_s30, 2  ;;  %s2167_s25 = scalar_lea.sflag [#allocation5], %s2166_s17 }
 0x411   : > { %p2353_p3 = pnand %p3343_p13, %p3342_p10 }
 0x413   : > { %2530 = dma.done.wait (!%p2353_p3), %s2167_s25, 1024  }
 0x414   : > { %2532 = vsyncadd (!%p2353_p3), %s2167_s25, 4294966272  ;;  %s3344_s30 = sld [smem:[#allocation12_spill]]  ;;  %s3345_s27 = smov %s2539_s28 }
 0x415   : > { %s3346_s28 = smov %s2543_s29  ;;  %s3347_s29 = smov %s2711_s23 }
 0x41a   : > { %p22_p7 = scmp.ge.s32.totalorder %s3344_s30, 4  }
 0x41c   :  { %24 = sbr.rel (!%p22_p7) target bundleno = 6 (0x6), region = 126 }
 0x423   :  { %2172 = vsyncpa [#allocation4], 1 }
 0x424   :  { %2174 = vsyncpa [#allocation4 + $0x1], 1 }
 0x425   :  { %2175 = vsyncpa [#allocation7], 1 }
 0x426   :  { %2176 = vsyncpa [#allocation5], 1 }
 0x427   :  { %2178 = vsyncpa [#allocation5 + $0x1], 1 }

</bundles_post_ra>
